<compile_context>
chip_gen: v7x
topology: tpu7x:2x2x1
jax: 0.10.0
libtpu: 0.0.40
codegen_flags: <defaults>
</compile_context>

<pallas_src>
import jax
import jax.numpy as jnp
from jax.experimental import pallas as pl
from jax.experimental.pallas import tpu as pltpu

B, S, D, H, DFF = 2, 8, 32, 4, 64     # batch, seq, d_model, heads, ffn-hidden
DK = D // H
D3 = 3 * D
EPS = 1e-6
NEG = -1e9


# --------------------------- Pallas kernel (one batch element / grid step) ---------------------------
def decoder_layer_kernel(x_ref, bias_ref, wqkv_ref, wo_ref, w1_ref, w2_ref,
                         small_ref, out_ref):
    """One batch element's (S, D) token slab per grid step.

    small_ref row layout: 0 = qkv bias (3D, scale folded into q part), 1 = Wo bias,
    2 = FFN b1, 3 = FFN b2, rows 4..6 = LayerNorm weights, rows 7..9 = LayerNorm biases.
    """

    def layer_norm(xn, idx):
        w = small_ref[4 + idx:5 + idx, :D]                   # (1, D)
        b = small_ref[7 + idx:8 + idx, :D]
        mean = jnp.mean(xn, axis=-1, keepdims=True)
        d = xn - mean
        var = jnp.sum(d * d, axis=-1, keepdims=True) * (1.0 / (D - 1))   # unbiased (ddof=1)
        inv = pl.reciprocal(jnp.sqrt(var) + EPS, approx=False)
        return d * (w * inv) + b

    def mha(xn, which):
        bias = bias_ref[which]                               # (S, S) additive mask bias
        # Fused QKV projection: one lane-dense (S,3D) matmul; scale already in Wq/bq.
        qkv = jnp.dot(xn, wqkv_ref[...],
                      preferred_element_type=jnp.float32) + small_ref[0:1, :]   # (S, 3D)
        heads = []
        for h in range(H):                                   # static, unrolled; same MXU op
            qh = qkv[:, 0 * D + h * DK:0 * D + (h + 1) * DK]  # count as a batched einsum
            kh = qkv[:, 1 * D + h * DK:1 * D + (h + 1) * DK]
            vh = qkv[:, 2 * D + h * DK:2 * D + (h + 1) * DK]
            s = jnp.einsum('qd,kd->qk', qh, kh,
                           preferred_element_type=jnp.float32) + bias           # (S, S)
            s = s - jnp.max(s, axis=-1, keepdims=True)
            e = jnp.exp(s)
            p = e * pl.reciprocal(jnp.sum(e, axis=-1, keepdims=True), approx=True)
            heads.append(jnp.dot(p, vh, preferred_element_type=jnp.float32))    # (S, DK)
        ctx = jnp.concatenate(heads, axis=-1)                 # (S, D) lane-dense
        # Fused output projection: single contraction over (head, dk).
        return jnp.dot(ctx, wo_ref[...],
                       preferred_element_type=jnp.float32) + small_ref[1:2, :D]

    x = x_ref[...]                                            # (S, D)
    # sublayer 0: pre-norm residual self-attention with tgt_mask (dropout == identity)
    x = x + mha(layer_norm(x, 0), 0)
    # sublayer 1: the reference re-uses self_attn with src_mask (memory unused)
    x = x + mha(layer_norm(x, 1), 1)
    # sublayer 2: position-wise feed-forward
    h = layer_norm(x, 2)
    ff = jnp.maximum(jnp.dot(h, w1_ref[...], preferred_element_type=jnp.float32)
                     + small_ref[2:3, :DFF], 0.0)
    ff = jnp.dot(ff, w2_ref[...], preferred_element_type=jnp.float32) + small_ref[3:4, :D]
    out_ref[...] = x + ff


# --------------------------------- wrapper ---------------------------------
def transformer_decoder_layer(x, memory, src_mask, tgt_mask, params):
    """memory accepted for API parity; the reference forward never uses it."""
    del memory
    Bn, Sn, Dn = x.shape

    # ------- wrapper-side (free) weight / mask preprocessing -------
    attn_w, attn_b = params["attn_w"], params["attn_b"]
    wq, wk, wv, wo = attn_w[0], attn_w[1], attn_w[2], attn_w[3]
    bq, bk, bv, bo = attn_b[0, 0], attn_b[1, 0], attn_b[2, 0], attn_b[3, 0]
    scale = 1.0 / (DK ** 0.5)

    # Fused QKV weight (D, 3D); 1/sqrt(dk) folded into the Wq / bq columns.
    wqkv = jnp.concatenate([wq * scale, wk, wv], axis=1)

    # Pack every sub-512B parameter tensor into one (10, 3D) slab -> one DMA.
    small = jnp.zeros((10, 3 * Dn), jnp.float32)
    small = small.at[0, :].set(jnp.concatenate([bq * scale, bk, bv]))
    small = small.at[1, :Dn].set(bo)
    small = small.at[2, :DFF].set(params["b1"][0])
    small = small.at[3, :Dn].set(params["b2"][0])
    small = small.at[4:7, :Dn].set(params["ln_w"][:, 0, :])
    small = small.at[7:10, :Dn].set(params["ln_b"][:, 0, :])

    # masks -> per-(S,S) additive biases; batch never enters the key axis, so no
    # block-diagonal (N,N) bias and no cross-batch attention work.
    def to_bias(mask):
        return jnp.where(mask == 0.0, jnp.float32(NEG), jnp.float32(0.0))
    bias2 = jnp.stack([to_bias(tgt_mask), to_bias(src_mask)])        # (2, S, S)

    x_flat = x.reshape(Bn * Sn, Dn)

    def full(shape):
        nd = len(shape)
        return pl.BlockSpec(shape, lambda b: (0,) * nd)              # whole-array block

    out_flat = pl.pallas_call(
        decoder_layer_kernel,
        out_shape=jax.ShapeDtypeStruct((Bn * Sn, Dn), jnp.float32),
        grid=(Bn,),                         # one batch element per step; parallel over TCs on v7x
        in_specs=[
            pl.BlockSpec((Sn, Dn), lambda b: (b, 0)),   # per-batch token slab
            full((2, Sn, Sn)),                          # additive biases (tgt, src)
            full((Dn, 3 * Dn)),                         # fused Wqkv (scale folded into Wq)
            full((Dn, Dn)),                             # Wo
            full((Dn, DFF)),                            # FFN W1
            full((DFF, Dn)),                            # FFN W2
            full((10, 3 * Dn)),                         # packed small params
        ],
        out_specs=pl.BlockSpec((Sn, Dn), lambda b: (b, 0)),
        compiler_params=pltpu.CompilerParams(dimension_semantics=("parallel",)),
    )(x_flat, bias2, wqkv, wo, params["w1"], params["w2"], small)

    return out_flat.reshape(Bn, Sn, Dn)


# ------------------------- pure-JAX reference (torch-faithful) -------------------------
def _ref_layer_norm(x, w, b):
    mean = jnp.mean(x, axis=-1, keepdims=True)
    var = jnp.sum((x - mean) ** 2, axis=-1, keepdims=True) / (x.shape[-1] - 1)
    return w * (x - mean) / (jnp.sqrt(var) + EPS) + b


def _ref_mha(x, mask, wq, bq, wk, bk, wv, bv, wo, bo):
    s_len, d = x.shape
    q = (x @ wq + bq).reshape(s_len, H, DK).transpose(1, 0, 2)
    k = (x @ wk + bk).reshape(s_len, H, DK).transpose(1, 0, 2)
    v = (x @ wv + bv).reshape(s_len, H, DK).transpose(1, 0, 2)
    scores = jnp.einsum('hqc,hkc->hqk', q, k) / jnp.sqrt(jnp.float32(DK))
    scores = jnp.where(mask[None] == 0.0, jnp.float32(NEG), scores)
    p = jax.nn.softmax(scores, axis=-1)
    ctx = jnp.einsum('hqk,hkc->hqc', p, v).transpose(1, 0, 2).reshape(s_len, d)
    return ctx @ wo + bo


def _ref_decoder_layer(x, tgt_mask, src_mask, params):
    wq, wk, wv, wo = (params["attn_w"][i] for i in range(4))
    bq, bk, bv, bo = (params["attn_b"][i, 0] for i in range(4))
    ln_w, ln_b = params["ln_w"], params["ln_b"]
    x = x + _ref_mha(_ref_layer_norm(x, ln_w[0], ln_b[0]), tgt_mask,
                     wq, bq, wk, bk, wv, bv, wo, bo)
    x = x + _ref_mha(_ref_layer_norm(x, ln_w[1], ln_b[1]), src_mask,
                     wq, bq, wk, bk, wv, bv, wo, bo)
    h = _ref_layer_norm(x, ln_w[2], ln_b[2])
    ff = jnp.maximum(h @ params["w1"] + params["b1"], 0.0) @ params["w2"] + params["b2"]
    return x + ff


if __name__ == "__main__":
    key = jax.random.PRNGKey(0)
    ks = jax.random.split(key, 10)
    sc = 0.05
    params = {
        "attn_w": jax.random.normal(ks[0], (4, D, D), jnp.float32) * sc,   # Wq, Wk, Wv, Wo (in, out)
        "attn_b": jax.random.normal(ks[1], (4, 1, D), jnp.float32) * sc,
        "w1": jax.random.normal(ks[2], (D, DFF), jnp.float32) * sc,
        "b1": jax.random.normal(ks[3], (1, DFF), jnp.float32) * sc,
        "w2": jax.random.normal(ks[4], (DFF, D), jnp.float32) * sc,
        "b2": jax.random.normal(ks[5], (1, D), jnp.float32) * sc,
        "ln_w": 1.0 + 0.1 * jax.random.normal(ks[8], (3, 1, D), jnp.float32),
        "ln_b": 0.1 * jax.random.normal(ks[9], (3, 1, D), jnp.float32),
    }

    x = jax.random.normal(ks[6], (B, S, D), jnp.float32)
    memory = jax.random.normal(ks[7], (B, S, D), jnp.float32)   # unused by the reference forward
    tgt_mask = jnp.tril(jnp.ones((S, S), jnp.float32))          # causal
    src_mask = jnp.ones((S, S), jnp.float32)                    # all-visible

    out = transformer_decoder_layer(x, memory, src_mask, tgt_mask, params)
    out = jax.block_until_ready(out)

    ref = jax.vmap(lambda xb: _ref_decoder_layer(xb, tgt_mask, src_mask, params))(x)
    err = float(jnp.max(jnp.abs(out - ref)))
    # 1e-3 tolerance: the softmax denominator now uses the EUP approximate reciprocal
    # (per the perf review); everything else stays f32-exact.
    assert jnp.allclose(out, ref, rtol=1e-3, atol=1e-3), err

    print("KERNEL_OK")
</pallas_src>

<mosaic_0001>
module attributes {stable_mosaic.version = 11 : i64} {
  func.func @decoder_layer_kernel(%arg0: i32, %arg1: memref<8x32xf32, #tpu.memory_space<vmem>>, %arg2: memref<2x8x8xf32, #tpu.memory_space<vmem>>, %arg3: memref<32x96xf32, #tpu.memory_space<vmem>>, %arg4: memref<32x32xf32, #tpu.memory_space<vmem>>, %arg5: memref<32x64xf32, #tpu.memory_space<vmem>>, %arg6: memref<64x32xf32, #tpu.memory_space<vmem>>, %arg7: memref<10x96xf32, #tpu.memory_space<vmem>>, %arg8: memref<8x32xf32, #tpu.memory_space<vmem>>) attributes {dimension_semantics = [#tpu.dimension_semantics<parallel>], iteration_bounds = array<i64: 2>, scalar_prefetch = 0 : i64, scratch_operands = 0 : i64, tpu.core_type = #tpu.core_type<tc>, window_params = [{transform_indices = @transform_0, window_bounds = array<i64: 8, 32>}, {pipeline_mode = #tpu.pipeline_mode<synchronous>, transform_indices = @transform_1, window_bounds = array<i64: 2, 8, 8>}, {pipeline_mode = #tpu.pipeline_mode<synchronous>, transform_indices = @transform_2, window_bounds = array<i64: 32, 96>}, {pipeline_mode = #tpu.pipeline_mode<synchronous>, transform_indices = @transform_3, window_bounds = array<i64: 32, 32>}, {pipeline_mode = #tpu.pipeline_mode<synchronous>, transform_indices = @transform_4, window_bounds = array<i64: 32, 64>}, {pipeline_mode = #tpu.pipeline_mode<synchronous>, transform_indices = @transform_5, window_bounds = array<i64: 64, 32>}, {pipeline_mode = #tpu.pipeline_mode<synchronous>, transform_indices = @transform_6, window_bounds = array<i64: 10, 96>}, {transform_indices = @transform_7, window_bounds = array<i64: 8, 32>}]} {
    %c0 = arith.constant 0 : index
    %c0_0 = arith.constant 0 : index
    %0 = vector.load %arg1[%c0, %c0_0] : memref<8x32xf32, #tpu.memory_space<vmem>>, vector<8x32xf32>
    %c4 = arith.constant 4 : index
    %c0_1 = arith.constant 0 : index
    %1 = vector.load %arg7[%c4, %c0_1] : memref<10x96xf32, #tpu.memory_space<vmem>>, vector<1x32xf32>
    %c7 = arith.constant 7 : index
    %c0_2 = arith.constant 0 : index
    %2 = vector.load %arg7[%c7, %c0_2] : memref<10x96xf32, #tpu.memory_space<vmem>>, vector<1x32xf32>
    %cst = arith.constant dense<0.000000e+00> : vector<8xf32>
    %3 = vector.multi_reduction <add>, %0, %cst [1] : vector<8x32xf32> to vector<8xf32>
    %4 = vector.shape_cast %3 : vector<8xf32> to vector<8x1xf32>
    %cst_3 = arith.constant 3.200000e+01 : f32
    %5 = vector.broadcast %cst_3 : f32 to vector<8x1xf32>
    %6 = arith.divf %4, %5 : vector<8x1xf32>
    %7 = vector.broadcast %6 : vector<8x1xf32> to vector<8x32xf32>
    %8 = arith.subf %0, %7 : vector<8x32xf32>
    %9 = arith.mulf %8, %8 : vector<8x32xf32>
    %cst_4 = arith.constant dense<0.000000e+00> : vector<8xf32>
    %10 = vector.multi_reduction <add>, %9, %cst_4 [1] : vector<8x32xf32> to vector<8xf32>
    %11 = vector.shape_cast %10 : vector<8xf32> to vector<8x1xf32>
    %cst_5 = arith.constant 0.0322580636 : f32
    %12 = vector.broadcast %cst_5 : f32 to vector<8x1xf32>
    %13 = arith.mulf %11, %12 : vector<8x1xf32>
    %14 = math.sqrt %13 : vector<8x1xf32>
    %cst_6 = arith.constant 9.99999997E-7 : f32
    %15 = vector.broadcast %cst_6 : f32 to vector<8x1xf32>
    %16 = arith.addf %14, %15 : vector<8x1xf32>
    %17 = tpu.reciprocal %16 : vector<8x1xf32> -> vector<8x1xf32>
    %18 = vector.broadcast %1 : vector<1x32xf32> to vector<8x32xf32>
    %19 = vector.broadcast %17 : vector<8x1xf32> to vector<8x32xf32>
    %20 = arith.mulf %18, %19 : vector<8x32xf32>
    %21 = arith.mulf %8, %20 : vector<8x32xf32>
    %22 = vector.broadcast %2 : vector<1x32xf32> to vector<8x32xf32>
    %23 = arith.addf %21, %22 : vector<8x32xf32>
    %c0_7 = arith.constant 0 : index
    %c0_8 = arith.constant 0 : index
    %c0_9 = arith.constant 0 : index
    %24 = vector.load %arg2[%c0_7, %c0_8, %c0_9] : memref<2x8x8xf32, #tpu.memory_space<vmem>>, vector<1x8x8xf32>
    %25 = vector.shape_cast %24 : vector<1x8x8xf32> to vector<8x8xf32>
    %c0_10 = arith.constant 0 : index
    %c0_11 = arith.constant 0 : index
    %26 = vector.load %arg3[%c0_10, %c0_11] : memref<32x96xf32, #tpu.memory_space<vmem>>, vector<32x96xf32>
    %cst_12 = arith.constant dense<0.000000e+00> : vector<8x96xf32>
    %27 = tpu.matmul %23, %26, %cst_12 {dimension_numbers = #tpu.dot_dimension_numbers<[1], [0], [0], [1], [0, 0, 1, 1], [], []>} : vector<8x32xf32>, vector<32x96xf32>, vector<8x96xf32> -> vector<8x96xf32>
    %c0_13 = arith.constant 0 : index
    %c0_14 = arith.constant 0 : index
    %28 = vector.load %arg7[%c0_13, %c0_14] : memref<10x96xf32, #tpu.memory_space<vmem>>, vector<1x96xf32>
    %29 = vector.broadcast %28 : vector<1x96xf32> to vector<8x96xf32>
    %30 = arith.addf %27, %29 : vector<8x96xf32>
    %31 = vector.extract_strided_slice %30 {offsets = [0, 0], sizes = [8, 8], strides = [1, 1]} : vector<8x96xf32> to vector<8x8xf32>
    %32 = vector.extract_strided_slice %30 {offsets = [0, 32], sizes = [8, 8], strides = [1, 1]} : vector<8x96xf32> to vector<8x8xf32>
    %33 = vector.extract_strided_slice %30 {offsets = [0, 64], sizes = [8, 8], strides = [1, 1]} : vector<8x96xf32> to vector<8x8xf32>
    "tpu.trace_start"() <{level = 10 : i32, message = "qd,kd->qk"}> : () -> ()
    %cst_15 = arith.constant dense<0.000000e+00> : vector<8x8xf32>
    %34 = tpu.matmul %31, %32, %cst_15 {dimension_numbers = #tpu.dot_dimension_numbers<[1], [1], [0], [0], [0, 0, 1, 0], [], []>} : vector<8x8xf32>, vector<8x8xf32>, vector<8x8xf32> -> vector<8x8xf32>
    "tpu.trace_stop"() : () -> ()
    %35 = arith.addf %34, %25 : vector<8x8xf32>
    %cst_16 = arith.constant dense<0xFF800000> : vector<8xf32>
    %36 = vector.multi_reduction <maximumf>, %35, %cst_16 [1] : vector<8x8xf32> to vector<8xf32>
    %37 = vector.shape_cast %36 : vector<8xf32> to vector<8x1xf32>
    %38 = vector.broadcast %37 : vector<8x1xf32> to vector<8x8xf32>
    %39 = arith.subf %35, %38 : vector<8x8xf32>
    %40 = math.exp %39 : vector<8x8xf32>
    %cst_17 = arith.constant dense<0.000000e+00> : vector<8xf32>
    %41 = vector.multi_reduction <add>, %40, %cst_17 [1] : vector<8x8xf32> to vector<8xf32>
    %42 = vector.shape_cast %41 : vector<8xf32> to vector<8x1xf32>
    %43 = tpu.reciprocal %42 {approx = true} : vector<8x1xf32> -> vector<8x1xf32>
    %44 = vector.broadcast %43 : vector<8x1xf32> to vector<8x8xf32>
    %45 = arith.mulf %40, %44 : vector<8x8xf32>
    %cst_18 = arith.constant dense<0.000000e+00> : vector<8x8xf32>
    %46 = tpu.matmul %45, %33, %cst_18 {dimension_numbers = #tpu.dot_dimension_numbers<[1], [0], [0], [1], [0, 0, 1, 1], [], []>} : vector<8x8xf32>, vector<8x8xf32>, vector<8x8xf32> -> vector<8x8xf32>
    %47 = vector.extract_strided_slice %30 {offsets = [0, 8], sizes = [8, 8], strides = [1, 1]} : vector<8x96xf32> to vector<8x8xf32>
    %48 = vector.extract_strided_slice %30 {offsets = [0, 40], sizes = [8, 8], strides = [1, 1]} : vector<8x96xf32> to vector<8x8xf32>
    %49 = vector.extract_strided_slice %30 {offsets = [0, 72], sizes = [8, 8], strides = [1, 1]} : vector<8x96xf32> to vector<8x8xf32>
    "tpu.trace_start"() <{level = 10 : i32, message = "qd,kd->qk"}> : () -> ()
    %cst_19 = arith.constant dense<0.000000e+00> : vector<8x8xf32>
    %50 = tpu.matmul %47, %48, %cst_19 {dimension_numbers = #tpu.dot_dimension_numbers<[1], [1], [0], [0], [0, 0, 1, 0], [], []>} : vector<8x8xf32>, vector<8x8xf32>, vector<8x8xf32> -> vector<8x8xf32>
    "tpu.trace_stop"() : () -> ()
    %51 = arith.addf %50, %25 : vector<8x8xf32>
    %cst_20 = arith.constant dense<0xFF800000> : vector<8xf32>
    %52 = vector.multi_reduction <maximumf>, %51, %cst_20 [1] : vector<8x8xf32> to vector<8xf32>
    %53 = vector.shape_cast %52 : vector<8xf32> to vector<8x1xf32>
    %54 = vector.broadcast %53 : vector<8x1xf32> to vector<8x8xf32>
    %55 = arith.subf %51, %54 : vector<8x8xf32>
    %56 = math.exp %55 : vector<8x8xf32>
    %cst_21 = arith.constant dense<0.000000e+00> : vector<8xf32>
    %57 = vector.multi_reduction <add>, %56, %cst_21 [1] : vector<8x8xf32> to vector<8xf32>
    %58 = vector.shape_cast %57 : vector<8xf32> to vector<8x1xf32>
    %59 = tpu.reciprocal %58 {approx = true} : vector<8x1xf32> -> vector<8x1xf32>
    %60 = vector.broadcast %59 : vector<8x1xf32> to vector<8x8xf32>
    %61 = arith.mulf %56, %60 : vector<8x8xf32>
    %cst_22 = arith.constant dense<0.000000e+00> : vector<8x8xf32>
    %62 = tpu.matmul %61, %49, %cst_22 {dimension_numbers = #tpu.dot_dimension_numbers<[1], [0], [0], [1], [0, 0, 1, 1], [], []>} : vector<8x8xf32>, vector<8x8xf32>, vector<8x8xf32> -> vector<8x8xf32>
    %63 = vector.extract_strided_slice %30 {offsets = [0, 16], sizes = [8, 8], strides = [1, 1]} : vector<8x96xf32> to vector<8x8xf32>
    %64 = vector.extract_strided_slice %30 {offsets = [0, 48], sizes = [8, 8], strides = [1, 1]} : vector<8x96xf32> to vector<8x8xf32>
    %65 = vector.extract_strided_slice %30 {offsets = [0, 80], sizes = [8, 8], strides = [1, 1]} : vector<8x96xf32> to vector<8x8xf32>
    "tpu.trace_start"() <{level = 10 : i32, message = "qd,kd->qk"}> : () -> ()
    %cst_23 = arith.constant dense<0.000000e+00> : vector<8x8xf32>
    %66 = tpu.matmul %63, %64, %cst_23 {dimension_numbers = #tpu.dot_dimension_numbers<[1], [1], [0], [0], [0, 0, 1, 0], [], []>} : vector<8x8xf32>, vector<8x8xf32>, vector<8x8xf32> -> vector<8x8xf32>
    "tpu.trace_stop"() : () -> ()
    %67 = arith.addf %66, %25 : vector<8x8xf32>
    %cst_24 = arith.constant dense<0xFF800000> : vector<8xf32>
    %68 = vector.multi_reduction <maximumf>, %67, %cst_24 [1] : vector<8x8xf32> to vector<8xf32>
    %69 = vector.shape_cast %68 : vector<8xf32> to vector<8x1xf32>
    %70 = vector.broadcast %69 : vector<8x1xf32> to vector<8x8xf32>
    %71 = arith.subf %67, %70 : vector<8x8xf32>
    %72 = math.exp %71 : vector<8x8xf32>
    %cst_25 = arith.constant dense<0.000000e+00> : vector<8xf32>
    %73 = vector.multi_reduction <add>, %72, %cst_25 [1] : vector<8x8xf32> to vector<8xf32>
    %74 = vector.shape_cast %73 : vector<8xf32> to vector<8x1xf32>
    %75 = tpu.reciprocal %74 {approx = true} : vector<8x1xf32> -> vector<8x1xf32>
    %76 = vector.broadcast %75 : vector<8x1xf32> to vector<8x8xf32>
    %77 = arith.mulf %72, %76 : vector<8x8xf32>
    %cst_26 = arith.constant dense<0.000000e+00> : vector<8x8xf32>
    %78 = tpu.matmul %77, %65, %cst_26 {dimension_numbers = #tpu.dot_dimension_numbers<[1], [0], [0], [1], [0, 0, 1, 1], [], []>} : vector<8x8xf32>, vector<8x8xf32>, vector<8x8xf32> -> vector<8x8xf32>
    %79 = vector.extract_strided_slice %30 {offsets = [0, 24], sizes = [8, 8], strides = [1, 1]} : vector<8x96xf32> to vector<8x8xf32>
    %80 = vector.extract_strided_slice %30 {offsets = [0, 56], sizes = [8, 8], strides = [1, 1]} : vector<8x96xf32> to vector<8x8xf32>
    %81 = vector.extract_strided_slice %30 {offsets = [0, 88], sizes = [8, 8], strides = [1, 1]} : vector<8x96xf32> to vector<8x8xf32>
    "tpu.trace_start"() <{level = 10 : i32, message = "qd,kd->qk"}> : () -> ()
    %cst_27 = arith.constant dense<0.000000e+00> : vector<8x8xf32>
    %82 = tpu.matmul %79, %80, %cst_27 {dimension_numbers = #tpu.dot_dimension_numbers<[1], [1], [0], [0], [0, 0, 1, 0], [], []>} : vector<8x8xf32>, vector<8x8xf32>, vector<8x8xf32> -> vector<8x8xf32>
    "tpu.trace_stop"() : () -> ()
    %83 = arith.addf %82, %25 : vector<8x8xf32>
    %cst_28 = arith.constant dense<0xFF800000> : vector<8xf32>
    %84 = vector.multi_reduction <maximumf>, %83, %cst_28 [1] : vector<8x8xf32> to vector<8xf32>
    %85 = vector.shape_cast %84 : vector<8xf32> to vector<8x1xf32>
    %86 = vector.broadcast %85 : vector<8x1xf32> to vector<8x8xf32>
    %87 = arith.subf %83, %86 : vector<8x8xf32>
    %88 = math.exp %87 : vector<8x8xf32>
    %cst_29 = arith.constant dense<0.000000e+00> : vector<8xf32>
    %89 = vector.multi_reduction <add>, %88, %cst_29 [1] : vector<8x8xf32> to vector<8xf32>
    %90 = vector.shape_cast %89 : vector<8xf32> to vector<8x1xf32>
    %91 = tpu.reciprocal %90 {approx = true} : vector<8x1xf32> -> vector<8x1xf32>
    %92 = vector.broadcast %91 : vector<8x1xf32> to vector<8x8xf32>
    %93 = arith.mulf %88, %92 : vector<8x8xf32>
    %cst_30 = arith.constant dense<0.000000e+00> : vector<8x8xf32>
    %94 = tpu.matmul %93, %81, %cst_30 {dimension_numbers = #tpu.dot_dimension_numbers<[1], [0], [0], [1], [0, 0, 1, 1], [], []>} : vector<8x8xf32>, vector<8x8xf32>, vector<8x8xf32> -> vector<8x8xf32>
    %95 = tpu.concatenate %46, %62, %78, %94 in 1 : vector<8x8xf32>, vector<8x8xf32>, vector<8x8xf32>, vector<8x8xf32> -> vector<8x32xf32>
    %c0_31 = arith.constant 0 : index
    %c0_32 = arith.constant 0 : index
    %96 = vector.load %arg4[%c0_31, %c0_32] : memref<32x32xf32, #tpu.memory_space<vmem>>, vector<32x32xf32>
    %cst_33 = arith.constant dense<0.000000e+00> : vector<8x32xf32>
    %97 = tpu.matmul %95, %96, %cst_33 {dimension_numbers = #tpu.dot_dimension_numbers<[1], [0], [0], [1], [0, 0, 1, 1], [], []>} : vector<8x32xf32>, vector<32x32xf32>, vector<8x32xf32> -> vector<8x32xf32>
    %c1 = arith.constant 1 : index
    %c0_34 = arith.constant 0 : index
    %98 = vector.load %arg7[%c1, %c0_34] : memref<10x96xf32, #tpu.memory_space<vmem>>, vector<1x32xf32>
    %99 = vector.broadcast %98 : vector<1x32xf32> to vector<8x32xf32>
    %100 = arith.addf %97, %99 : vector<8x32xf32>
    %101 = arith.addf %0, %100 : vector<8x32xf32>
    %c5 = arith.constant 5 : index
    %c0_35 = arith.constant 0 : index
    %102 = vector.load %arg7[%c5, %c0_35] : memref<10x96xf32, #tpu.memory_space<vmem>>, vector<1x32xf32>
    %c8 = arith.constant 8 : index
    %c0_36 = arith.constant 0 : index
    %103 = vector.load %arg7[%c8, %c0_36] : memref<10x96xf32, #tpu.memory_space<vmem>>, vector<1x32xf32>
    %cst_37 = arith.constant dense<0.000000e+00> : vector<8xf32>
    %104 = vector.multi_reduction <add>, %101, %cst_37 [1] : vector<8x32xf32> to vector<8xf32>
    %105 = vector.shape_cast %104 : vector<8xf32> to vector<8x1xf32>
    %cst_38 = arith.constant 3.200000e+01 : f32
    %106 = vector.broadcast %cst_38 : f32 to vector<8x1xf32>
    %107 = arith.divf %105, %106 : vector<8x1xf32>
    %108 = vector.broadcast %107 : vector<8x1xf32> to vector<8x32xf32>
    %109 = arith.subf %101, %108 : vector<8x32xf32>
    %110 = arith.mulf %109, %109 : vector<8x32xf32>
    %cst_39 = arith.constant dense<0.000000e+00> : vector<8xf32>
    %111 = vector.multi_reduction <add>, %110, %cst_39 [1] : vector<8x32xf32> to vector<8xf32>
    %112 = vector.shape_cast %111 : vector<8xf32> to vector<8x1xf32>
    %cst_40 = arith.constant 0.0322580636 : f32
    %113 = vector.broadcast %cst_40 : f32 to vector<8x1xf32>
    %114 = arith.mulf %112, %113 : vector<8x1xf32>
    %115 = math.sqrt %114 : vector<8x1xf32>
    %cst_41 = arith.constant 9.99999997E-7 : f32
    %116 = vector.broadcast %cst_41 : f32 to vector<8x1xf32>
    %117 = arith.addf %115, %116 : vector<8x1xf32>
    %118 = tpu.reciprocal %117 : vector<8x1xf32> -> vector<8x1xf32>
    %119 = vector.broadcast %102 : vector<1x32xf32> to vector<8x32xf32>
    %120 = vector.broadcast %118 : vector<8x1xf32> to vector<8x32xf32>
    %121 = arith.mulf %119, %120 : vector<8x32xf32>
    %122 = arith.mulf %109, %121 : vector<8x32xf32>
    %123 = vector.broadcast %103 : vector<1x32xf32> to vector<8x32xf32>
    %124 = arith.addf %122, %123 : vector<8x32xf32>
    %c1_42 = arith.constant 1 : index
    %c0_43 = arith.constant 0 : index
    %c0_44 = arith.constant 0 : index
    %125 = vector.load %arg2[%c1_42, %c0_43, %c0_44] : memref<2x8x8xf32, #tpu.memory_space<vmem>>, vector<1x8x8xf32>
    %126 = vector.shape_cast %125 : vector<1x8x8xf32> to vector<8x8xf32>
    %c0_45 = arith.constant 0 : index
    %c0_46 = arith.constant 0 : index
    %127 = vector.load %arg3[%c0_45, %c0_46] : memref<32x96xf32, #tpu.memory_space<vmem>>, vector<32x96xf32>
    %cst_47 = arith.constant dense<0.000000e+00> : vector<8x96xf32>
    %128 = tpu.matmul %124, %127, %cst_47 {dimension_numbers = #tpu.dot_dimension_numbers<[1], [0], [0], [1], [0, 0, 1, 1], [], []>} : vector<8x32xf32>, vector<32x96xf32>, vector<8x96xf32> -> vector<8x96xf32>
    %c0_48 = arith.constant 0 : index
    %c0_49 = arith.constant 0 : index
    %129 = vector.load %arg7[%c0_48, %c0_49] : memref<10x96xf32, #tpu.memory_space<vmem>>, vector<1x96xf32>
    %130 = vector.broadcast %129 : vector<1x96xf32> to vector<8x96xf32>
    %131 = arith.addf %128, %130 : vector<8x96xf32>
    %132 = vector.extract_strided_slice %131 {offsets = [0, 0], sizes = [8, 8], strides = [1, 1]} : vector<8x96xf32> to vector<8x8xf32>
    %133 = vector.extract_strided_slice %131 {offsets = [0, 32], sizes = [8, 8], strides = [1, 1]} : vector<8x96xf32> to vector<8x8xf32>
    %134 = vector.extract_strided_slice %131 {offsets = [0, 64], sizes = [8, 8], strides = [1, 1]} : vector<8x96xf32> to vector<8x8xf32>
    "tpu.trace_start"() <{level = 10 : i32, message = "qd,kd->qk"}> : () -> ()
    %cst_50 = arith.constant dense<0.000000e+00> : vector<8x8xf32>
    %135 = tpu.matmul %132, %133, %cst_50 {dimension_numbers = #tpu.dot_dimension_numbers<[1], [1], [0], [0], [0, 0, 1, 0], [], []>} : vector<8x8xf32>, vector<8x8xf32>, vector<8x8xf32> -> vector<8x8xf32>
    "tpu.trace_stop"() : () -> ()
    %136 = arith.addf %135, %126 : vector<8x8xf32>
    %cst_51 = arith.constant dense<0xFF800000> : vector<8xf32>
    %137 = vector.multi_reduction <maximumf>, %136, %cst_51 [1] : vector<8x8xf32> to vector<8xf32>
    %138 = vector.shape_cast %137 : vector<8xf32> to vector<8x1xf32>
    %139 = vector.broadcast %138 : vector<8x1xf32> to vector<8x8xf32>
    %140 = arith.subf %136, %139 : vector<8x8xf32>
    %141 = math.exp %140 : vector<8x8xf32>
    %cst_52 = arith.constant dense<0.000000e+00> : vector<8xf32>
    %142 = vector.multi_reduction <add>, %141, %cst_52 [1] : vector<8x8xf32> to vector<8xf32>
    %143 = vector.shape_cast %142 : vector<8xf32> to vector<8x1xf32>
    %144 = tpu.reciprocal %143 {approx = true} : vector<8x1xf32> -> vector<8x1xf32>
    %145 = vector.broadcast %144 : vector<8x1xf32> to vector<8x8xf32>
    %146 = arith.mulf %141, %145 : vector<8x8xf32>
    %cst_53 = arith.constant dense<0.000000e+00> : vector<8x8xf32>
    %147 = tpu.matmul %146, %134, %cst_53 {dimension_numbers = #tpu.dot_dimension_numbers<[1], [0], [0], [1], [0, 0, 1, 1], [], []>} : vector<8x8xf32>, vector<8x8xf32>, vector<8x8xf32> -> vector<8x8xf32>
    %148 = vector.extract_strided_slice %131 {offsets = [0, 8], sizes = [8, 8], strides = [1, 1]} : vector<8x96xf32> to vector<8x8xf32>
    %149 = vector.extract_strided_slice %131 {offsets = [0, 40], sizes = [8, 8], strides = [1, 1]} : vector<8x96xf32> to vector<8x8xf32>
    %150 = vector.extract_strided_slice %131 {offsets = [0, 72], sizes = [8, 8], strides = [1, 1]} : vector<8x96xf32> to vector<8x8xf32>
    "tpu.trace_start"() <{level = 10 : i32, message = "qd,kd->qk"}> : () -> ()
    %cst_54 = arith.constant dense<0.000000e+00> : vector<8x8xf32>
    %151 = tpu.matmul %148, %149, %cst_54 {dimension_numbers = #tpu.dot_dimension_numbers<[1], [1], [0], [0], [0, 0, 1, 0], [], []>} : vector<8x8xf32>, vector<8x8xf32>, vector<8x8xf32> -> vector<8x8xf32>
    "tpu.trace_stop"() : () -> ()
    %152 = arith.addf %151, %126 : vector<8x8xf32>
    %cst_55 = arith.constant dense<0xFF800000> : vector<8xf32>
    %153 = vector.multi_reduction <maximumf>, %152, %cst_55 [1] : vector<8x8xf32> to vector<8xf32>
    %154 = vector.shape_cast %153 : vector<8xf32> to vector<8x1xf32>
    %155 = vector.broadcast %154 : vector<8x1xf32> to vector<8x8xf32>
    %156 = arith.subf %152, %155 : vector<8x8xf32>
    %157 = math.exp %156 : vector<8x8xf32>
    %cst_56 = arith.constant dense<0.000000e+00> : vector<8xf32>
    %158 = vector.multi_reduction <add>, %157, %cst_56 [1] : vector<8x8xf32> to vector<8xf32>
    %159 = vector.shape_cast %158 : vector<8xf32> to vector<8x1xf32>
    %160 = tpu.reciprocal %159 {approx = true} : vector<8x1xf32> -> vector<8x1xf32>
    %161 = vector.broadcast %160 : vector<8x1xf32> to vector<8x8xf32>
    %162 = arith.mulf %157, %161 : vector<8x8xf32>
    %cst_57 = arith.constant dense<0.000000e+00> : vector<8x8xf32>
    %163 = tpu.matmul %162, %150, %cst_57 {dimension_numbers = #tpu.dot_dimension_numbers<[1], [0], [0], [1], [0, 0, 1, 1], [], []>} : vector<8x8xf32>, vector<8x8xf32>, vector<8x8xf32> -> vector<8x8xf32>
    %164 = vector.extract_strided_slice %131 {offsets = [0, 16], sizes = [8, 8], strides = [1, 1]} : vector<8x96xf32> to vector<8x8xf32>
    %165 = vector.extract_strided_slice %131 {offsets = [0, 48], sizes = [8, 8], strides = [1, 1]} : vector<8x96xf32> to vector<8x8xf32>
    %166 = vector.extract_strided_slice %131 {offsets = [0, 80], sizes = [8, 8], strides = [1, 1]} : vector<8x96xf32> to vector<8x8xf32>
    "tpu.trace_start"() <{level = 10 : i32, message = "qd,kd->qk"}> : () -> ()
    %cst_58 = arith.constant dense<0.000000e+00> : vector<8x8xf32>
    %167 = tpu.matmul %164, %165, %cst_58 {dimension_numbers = #tpu.dot_dimension_numbers<[1], [1], [0], [0], [0, 0, 1, 0], [], []>} : vector<8x8xf32>, vector<8x8xf32>, vector<8x8xf32> -> vector<8x8xf32>
    "tpu.trace_stop"() : () -> ()
    %168 = arith.addf %167, %126 : vector<8x8xf32>
    %cst_59 = arith.constant dense<0xFF800000> : vector<8xf32>
    %169 = vector.multi_reduction <maximumf>, %168, %cst_59 [1] : vector<8x8xf32> to vector<8xf32>
    %170 = vector.shape_cast %169 : vector<8xf32> to vector<8x1xf32>
    %171 = vector.broadcast %170 : vector<8x1xf32> to vector<8x8xf32>
    %172 = arith.subf %168, %171 : vector<8x8xf32>
    %173 = math.exp %172 : vector<8x8xf32>
    %cst_60 = arith.constant dense<0.000000e+00> : vector<8xf32>
    %174 = vector.multi_reduction <add>, %173, %cst_60 [1] : vector<8x8xf32> to vector<8xf32>
    %175 = vector.shape_cast %174 : vector<8xf32> to vector<8x1xf32>
    %176 = tpu.reciprocal %175 {approx = true} : vector<8x1xf32> -> vector<8x1xf32>
    %177 = vector.broadcast %176 : vector<8x1xf32> to vector<8x8xf32>
    %178 = arith.mulf %173, %177 : vector<8x8xf32>
    %cst_61 = arith.constant dense<0.000000e+00> : vector<8x8xf32>
    %179 = tpu.matmul %178, %166, %cst_61 {dimension_numbers = #tpu.dot_dimension_numbers<[1], [0], [0], [1], [0, 0, 1, 1], [], []>} : vector<8x8xf32>, vector<8x8xf32>, vector<8x8xf32> -> vector<8x8xf32>
    %180 = vector.extract_strided_slice %131 {offsets = [0, 24], sizes = [8, 8], strides = [1, 1]} : vector<8x96xf32> to vector<8x8xf32>
    %181 = vector.extract_strided_slice %131 {offsets = [0, 56], sizes = [8, 8], strides = [1, 1]} : vector<8x96xf32> to vector<8x8xf32>
    %182 = vector.extract_strided_slice %131 {offsets = [0, 88], sizes = [8, 8], strides = [1, 1]} : vector<8x96xf32> to vector<8x8xf32>
    "tpu.trace_start"() <{level = 10 : i32, message = "qd,kd->qk"}> : () -> ()
    %cst_62 = arith.constant dense<0.000000e+00> : vector<8x8xf32>
    %183 = tpu.matmul %180, %181, %cst_62 {dimension_numbers = #tpu.dot_dimension_numbers<[1], [1], [0], [0], [0, 0, 1, 0], [], []>} : vector<8x8xf32>, vector<8x8xf32>, vector<8x8xf32> -> vector<8x8xf32>
    "tpu.trace_stop"() : () -> ()
    %184 = arith.addf %183, %126 : vector<8x8xf32>
    %cst_63 = arith.constant dense<0xFF800000> : vector<8xf32>
    %185 = vector.multi_reduction <maximumf>, %184, %cst_63 [1] : vector<8x8xf32> to vector<8xf32>
    %186 = vector.shape_cast %185 : vector<8xf32> to vector<8x1xf32>
    %187 = vector.broadcast %186 : vector<8x1xf32> to vector<8x8xf32>
    %188 = arith.subf %184, %187 : vector<8x8xf32>
    %189 = math.exp %188 : vector<8x8xf32>
    %cst_64 = arith.constant dense<0.000000e+00> : vector<8xf32>
    %190 = vector.multi_reduction <add>, %189, %cst_64 [1] : vector<8x8xf32> to vector<8xf32>
    %191 = vector.shape_cast %190 : vector<8xf32> to vector<8x1xf32>
    %192 = tpu.reciprocal %191 {approx = true} : vector<8x1xf32> -> vector<8x1xf32>
    %193 = vector.broadcast %192 : vector<8x1xf32> to vector<8x8xf32>
    %194 = arith.mulf %189, %193 : vector<8x8xf32>
    %cst_65 = arith.constant dense<0.000000e+00> : vector<8x8xf32>
    %195 = tpu.matmul %194, %182, %cst_65 {dimension_numbers = #tpu.dot_dimension_numbers<[1], [0], [0], [1], [0, 0, 1, 1], [], []>} : vector<8x8xf32>, vector<8x8xf32>, vector<8x8xf32> -> vector<8x8xf32>
    %196 = tpu.concatenate %147, %163, %179, %195 in 1 : vector<8x8xf32>, vector<8x8xf32>, vector<8x8xf32>, vector<8x8xf32> -> vector<8x32xf32>
    %c0_66 = arith.constant 0 : index
    %c0_67 = arith.constant 0 : index
    %197 = vector.load %arg4[%c0_66, %c0_67] : memref<32x32xf32, #tpu.memory_space<vmem>>, vector<32x32xf32>
    %cst_68 = arith.constant dense<0.000000e+00> : vector<8x32xf32>
    %198 = tpu.matmul %196, %197, %cst_68 {dimension_numbers = #tpu.dot_dimension_numbers<[1], [0], [0], [1], [0, 0, 1, 1], [], []>} : vector<8x32xf32>, vector<32x32xf32>, vector<8x32xf32> -> vector<8x32xf32>
    %c1_69 = arith.constant 1 : index
    %c0_70 = arith.constant 0 : index
    %199 = vector.load %arg7[%c1_69, %c0_70] : memref<10x96xf32, #tpu.memory_space<vmem>>, vector<1x32xf32>
    %200 = vector.broadcast %199 : vector<1x32xf32> to vector<8x32xf32>
    %201 = arith.addf %198, %200 : vector<8x32xf32>
    %202 = arith.addf %101, %201 : vector<8x32xf32>
    %c6 = arith.constant 6 : index
    %c0_71 = arith.constant 0 : index
    %203 = vector.load %arg7[%c6, %c0_71] : memref<10x96xf32, #tpu.memory_space<vmem>>, vector<1x32xf32>
    %c9 = arith.constant 9 : index
    %c0_72 = arith.constant 0 : index
    %204 = vector.load %arg7[%c9, %c0_72] : memref<10x96xf32, #tpu.memory_space<vmem>>, vector<1x32xf32>
    %cst_73 = arith.constant dense<0.000000e+00> : vector<8xf32>
    %205 = vector.multi_reduction <add>, %202, %cst_73 [1] : vector<8x32xf32> to vector<8xf32>
    %206 = vector.shape_cast %205 : vector<8xf32> to vector<8x1xf32>
    %cst_74 = arith.constant 3.200000e+01 : f32
    %207 = vector.broadcast %cst_74 : f32 to vector<8x1xf32>
    %208 = arith.divf %206, %207 : vector<8x1xf32>
    %209 = vector.broadcast %208 : vector<8x1xf32> to vector<8x32xf32>
    %210 = arith.subf %202, %209 : vector<8x32xf32>
    %211 = arith.mulf %210, %210 : vector<8x32xf32>
    %cst_75 = arith.constant dense<0.000000e+00> : vector<8xf32>
    %212 = vector.multi_reduction <add>, %211, %cst_75 [1] : vector<8x32xf32> to vector<8xf32>
    %213 = vector.shape_cast %212 : vector<8xf32> to vector<8x1xf32>
    %cst_76 = arith.constant 0.0322580636 : f32
    %214 = vector.broadcast %cst_76 : f32 to vector<8x1xf32>
    %215 = arith.mulf %213, %214 : vector<8x1xf32>
    %216 = math.sqrt %215 : vector<8x1xf32>
    %cst_77 = arith.constant 9.99999997E-7 : f32
    %217 = vector.broadcast %cst_77 : f32 to vector<8x1xf32>
    %218 = arith.addf %216, %217 : vector<8x1xf32>
    %219 = tpu.reciprocal %218 : vector<8x1xf32> -> vector<8x1xf32>
    %220 = vector.broadcast %203 : vector<1x32xf32> to vector<8x32xf32>
    %221 = vector.broadcast %219 : vector<8x1xf32> to vector<8x32xf32>
    %222 = arith.mulf %220, %221 : vector<8x32xf32>
    %223 = arith.mulf %210, %222 : vector<8x32xf32>
    %224 = vector.broadcast %204 : vector<1x32xf32> to vector<8x32xf32>
    %225 = arith.addf %223, %224 : vector<8x32xf32>
    %c0_78 = arith.constant 0 : index
    %c0_79 = arith.constant 0 : index
    %226 = vector.load %arg5[%c0_78, %c0_79] : memref<32x64xf32, #tpu.memory_space<vmem>>, vector<32x64xf32>
    %cst_80 = arith.constant dense<0.000000e+00> : vector<8x64xf32>
    %227 = tpu.matmul %225, %226, %cst_80 {dimension_numbers = #tpu.dot_dimension_numbers<[1], [0], [0], [1], [0, 0, 1, 1], [], []>} : vector<8x32xf32>, vector<32x64xf32>, vector<8x64xf32> -> vector<8x64xf32>
    %c2 = arith.constant 2 : index
    %c0_81 = arith.constant 0 : index
    %228 = vector.load %arg7[%c2, %c0_81] : memref<10x96xf32, #tpu.memory_space<vmem>>, vector<1x64xf32>
    %229 = vector.broadcast %228 : vector<1x64xf32> to vector<8x64xf32>
    %230 = arith.addf %227, %229 : vector<8x64xf32>
    %cst_82 = arith.constant 0.000000e+00 : f32
    %231 = vector.broadcast %cst_82 : f32 to vector<8x64xf32>
    %232 = arith.maximumf %230, %231 : vector<8x64xf32>
    %c0_83 = arith.constant 0 : index
    %c0_84 = arith.constant 0 : index
    %233 = vector.load %arg6[%c0_83, %c0_84] : memref<64x32xf32, #tpu.memory_space<vmem>>, vector<64x32xf32>
    %cst_85 = arith.constant dense<0.000000e+00> : vector<8x32xf32>
    %234 = tpu.matmul %232, %233, %cst_85 {dimension_numbers = #tpu.dot_dimension_numbers<[1], [0], [0], [1], [0, 0, 1, 1], [], []>} : vector<8x64xf32>, vector<64x32xf32>, vector<8x32xf32> -> vector<8x32xf32>
    %c3 = arith.constant 3 : index
    %c0_86 = arith.constant 0 : index
    %235 = vector.load %arg7[%c3, %c0_86] : memref<10x96xf32, #tpu.memory_space<vmem>>, vector<1x32xf32>
    %236 = vector.broadcast %235 : vector<1x32xf32> to vector<8x32xf32>
    %237 = arith.addf %234, %236 : vector<8x32xf32>
    %238 = arith.addf %202, %237 : vector<8x32xf32>
    %c0_87 = arith.constant 0 : index
    %c0_88 = arith.constant 0 : index
    %239 = vector.load %arg8[%c0_87, %c0_88] : memref<8x32xf32, #tpu.memory_space<vmem>>, vector<8x32xf32>
    tpu.vector_store %arg8[%c0_87, %c0_88], %238 {strides = array<i32>} : memref<8x32xf32, #tpu.memory_space<vmem>>, vector<8x32xf32>,
    return
  }
  func.func @transform_0(%arg0: i32) -> (i32, i32) {
    %c0_i32 = arith.constant 0 : i32
    %c0_i32_0 = arith.constant 0 : i32
    return %arg0, %c0_i32 : i32, i32
  }
  func.func @transform_1(%arg0: i32) -> (i32, i32, i32) {
    %c0_i32 = arith.constant 0 : i32
    %c0_i32_0 = arith.constant 0 : i32
    %c0_i32_1 = arith.constant 0 : i32
    %c0_i32_2 = arith.constant 0 : i32
    return %c0_i32, %c0_i32_0, %c0_i32_1 : i32, i32, i32
  }
  func.func @transform_2(%arg0: i32) -> (i32, i32) {
    %c0_i32 = arith.constant 0 : i32
    %c0_i32_0 = arith.constant 0 : i32
    %c0_i32_1 = arith.constant 0 : i32
    return %c0_i32, %c0_i32_0 : i32, i32
  }
  func.func @transform_3(%arg0: i32) -> (i32, i32) {
    %c0_i32 = arith.constant 0 : i32
    %c0_i32_0 = arith.constant 0 : i32
    %c0_i32_1 = arith.constant 0 : i32
    return %c0_i32, %c0_i32_0 : i32, i32
  }
  func.func @transform_4(%arg0: i32) -> (i32, i32) {
    %c0_i32 = arith.constant 0 : i32
    %c0_i32_0 = arith.constant 0 : i32
    %c0_i32_1 = arith.constant 0 : i32
    return %c0_i32, %c0_i32_0 : i32, i32
  }
  func.func @transform_5(%arg0: i32) -> (i32, i32) {
    %c0_i32 = arith.constant 0 : i32
    %c0_i32_0 = arith.constant 0 : i32
    %c0_i32_1 = arith.constant 0 : i32
    return %c0_i32, %c0_i32_0 : i32, i32
  }
  func.func @transform_6(%arg0: i32) -> (i32, i32) {
    %c0_i32 = arith.constant 0 : i32
    %c0_i32_0 = arith.constant 0 : i32
    %c0_i32_1 = arith.constant 0 : i32
    return %c0_i32, %c0_i32_0 : i32, i32
  }
  func.func @transform_7(%arg0: i32) -> (i32, i32) {
    %c0_i32 = arith.constant 0 : i32
    %c0_i32_0 = arith.constant 0 : i32
    return %arg0, %c0_i32 : i32, i32
  }
}

</mosaic_0001>

<bundles_post_ra>
// kernel: tpu_custom_call.1
= control target key start
LH: loop header
LB: loop body
LE: loop exit
PB: predicated region body
PF: predicated region fallthrough
CT: control target
= control target key end

     0   :  { %12 = vsyncpa [#allocation3], 0  ;;  %s3505_s0 = inlined_call_operand.hbm [shape: f32[16,32], index: 0, kind: input, shape index: {}]   ;;  %s3506_s1 = inlined_call_operand.hbm [shape: f32[2,8,8], index: 1, kind: input, shape index: {}]   ;;  %s3507_s2 = inlined_call_operand.vmem [shape: f32[32,96], index: 2, kind: input, shape index: {}]   ;;  %s3508_s3 = inlined_call_operand.vmem [shape: f32[32,32], index: 3, kind: input, shape index: {}]   ;;  %s3509_s4 = inlined_call_operand.vmem [shape: f32[32,64], index: 4, kind: input, shape index: {}]   ;;  %s3510_s5 = inlined_call_operand.vmem [shape: f32[64,32], index: 5, kind: input, shape index: {}]   ;;  %s3511_s6 = inlined_call_operand.vmem [shape: f32[10,96], index: 6, kind: input, shape index: {}]   ;;  %s3512_s7 = inlined_call_operand.hbm [shape: f32[16,32], index: 7, kind: output, shape index: {}]  }
   0x1   :  { %14 = vsyncpa [#allocation3 + $0x1], 0 }
   0x2   :  { %15 = vsyncpa [#allocation6], 0 }
   0x3   :  { %16 = vsyncpa [#allocation4], 0 }
   0x4   :  { %18 = vsyncpa [#allocation4 + $0x1], 0  ;;  %s2988_s24 = smov 0   ;;  %s2990_s25 = smov 0  }
   0x5   :  { %s2992_s26 = smov 0   ;;  %s2994_s27 = smov 0  }
   0x6 LB: > { %s3009_s28 = sadd.s32 4294967295, %s2924_s27   ;;  %s2358_s29 = sadd.s32 4294967294, %s2924_s27   ;;  %s2924_s27 = sphi %s2994_s27, %s3546_s27   ;;  %s2920_s26 = sphi %s2992_s26, %s3545_s26   ;;  %s2916_s25 = sphi %s2990_s25, %s3544_s25   ;;  %s2912_s24 = sphi %s2988_s24, %s3543_s24  }
   0x7   : > { %p44_p0 = scmp.ne.s32.totalorder %s2916_s25, %s2912_s24  ;;  %p3513_p1 = scmp.eq.s32.totalorder %s3009_s28, 0 }
   0x8   : > { %p200_p3 = scmp.eq.s32.totalorder %s2358_s29, 1  ;;  %p2359_p5 = scmp.ge.s32.totalorder %s2924_s27, 1 }
   0x9   : > { %p3018_p4 = por %p3513_p1, %p44_p0  ;;  %p207_p7 = scmp.lt.s32.totalorder %s2924_s27, 3 }
   0xa   : > { %p3023_p6 = por %p200_p3, %p44_p0  ;;  %s2926_s10 = smov [#allocation5]  }
   0xb   : > { %s3523_s30 = scalar_select %p3018_p4, 1, 0 }
   0xc   : > { %s3524_s8 = scalar_select %p3023_p6, 1, 0 }
   0xd   : > { %p3028_p8 = pnand %p2359_p5, %p207_p7  ;;  %s219_s11 = sshll.u32 %s2926_s10, 4  ;;  %s3032_s11 = int_to_ptr.vmem [resolvable:$true] %s219_s11 }
   0xe   : > { %s3044_s13 = sadd.s32 1, %s2924_s27   ;;  %s31_s14 = sadd.s32 1, %s2920_s26 }
   0xf   : > { %s3525_s9 = scalar_select %p3028_p8, 1, 0 }
  0x10   : > { %p2684_p9 = pneg %p3028_p8  ;;  %s28_s15 = ssub.s32 %s2924_s27, %s3044_s13 }
  0x11   : > { %s2796_s18 = scalar_lea.hbm %s3506_s1, 256 }
  0x12   : > { %p3039_p11 = pnand %p2684_p9, %p3513_p1  ;;  %p2797_p12 = scmp.ne.s32.totalorder %s3506_s1, %s2796_s18 }
  0x13   : > { %p2803_p5 = scmp.lt.u32.totalorder %s2796_s18, %s3506_s1 }
  0x14   : > { %p2798_p13 = pneg %p3039_p11 }
  0x16   : > { %p2799_p0 = pnand %p2798_p13, %p2797_p12 }
  0x18   : > { %p2800_p3 = pneg %p2799_p0 }
  0x1a   : > { %p2805_p7 = pnand %p2803_p5, %p2800_p3 }
  0x1c   : > { %2808 = shalt.err (!%p2805_p7)
}
  0x1d   : > { %s2809_s23 = scalar_lea.vmem %s3032_s11, 256  ;;  %p2817_p2 = scmp.lt.s32.totalorder %s3032_s11, %s3032_s11 }
  0x1e   : > { %p2810_p9 = scmp.ne.s32.totalorder %s3032_s11, %s2809_s23  ;;  %p2818_p6 = scmp.lt.s32.totalorder %s2809_s23, %s2809_s23 }
  0x20   : > { %p2812_p10 = pnand %p2810_p9, %p2798_p13  ;;  %p2819_p4 = por %p2818_p6, %p2817_p2 }
  0x22   : > { %p2813_p1 = pneg %p2812_p10 }
  0x24   : > { %p2820_p8 = pnand %p2819_p4, %p2813_p1 }
  0x26   : > { %2823 = shalt.err (!%p2820_p8)
}
  0x27   : > { %s2927_s29 = smov 128   ;;  %s2928_s10 = smov 8  }
  0x28   : > { %2687 = dma.hbm_to_vmem [thread:$0]  (!%p3039_p11), %s3506_s1, 256, %s3032_s11, [#allocation6], %s2927_s29, %s2927_s29, %s2928_s10  }
  0x29   : > { %p29_p2 = scmp.eq.s32.totalorder %s28_s15, 0  ;;  %p38_p1 = scmp.ne.s32.totalorder %s2920_s26, %s2916_s25 }
  0x2a   : > { %p39_p4 = scmp.eq.s32.totalorder %s2924_s27, 0  ;;  %p2697_p6 = scmp.lt.s32.totalorder %s2924_s27, 2 }
  0x2b   : > { %s3075_s18 = scalar_select %p29_p2, %s2920_s26, %s31_s14  }
  0x2c   : > { %p40_p8 = por %p39_p4, %p38_p1  ;;  %p3527_p10 = scmp.eq.s32.totalorder %s3009_s28, 1 }
  0x2d   : > { %s248_s20 = sand.u32 1, %s2920_s26   ;;  %s2363_s21 = sshll.u32 %s2924_s27, 7 }
  0x2e   : > { %p3079_p12 = por %p3527_p10, %p38_p1  ;;  %s2362_s22 = sshll.u32 %s248_s20, 3 }
  0x2f   : > { %s3088_s16 = scalar_lea.hbm %s3505_s0, %s2363_s21  ;;  %s252_s11 = scalar_lea.vmem [#allocation2], %s2362_s22 }
  0x30   : > { %s259_s14 = sshll.u32 %s252_s11, 4  ;;  %p3090_p11 = pnand %p2697_p6, %p40_p8  ;;  %s3094_s14 = int_to_ptr.vmem [resolvable:$true] %s259_s14 }
  0x31   : > { %s249_s29 = scalar_lea.sflag [#allocation3], %s248_s20  ;;  %s2824_s10 = scalar_lea.hbm %s3088_s16, 128 }
  0x32   : > { %p2825_p13 = scmp.ne.s32.totalorder %s3088_s16, %s2824_s10  ;;  %p2826_p0 = pneg %p3090_p11 }
  0x33   : > { %s2829_s22 = scalar_lea.hbm %s3505_s0, 256  ;;  %p2830_p7 = scmp.lt.u32.totalorder %s3088_s16, %s3505_s0 }
  0x34   : > { %p2827_p3 = pnand %p2826_p0, %p2825_p13  ;;  %p2831_p9 = scmp.lt.u32.totalorder %s2829_s22, %s2824_s10 }
  0x35   : > { %p2833_p1 = scmp.lt.u32.totalorder %s2824_s10, %s3088_s16 }
  0x36   : > { %p2828_p5 = pneg %p2827_p3  ;;  %p2832_p2 = por %p2831_p9, %p2830_p7 }
  0x38   : > { %p2834_p4 = por %p2833_p1, %p2832_p2 }
  0x3a   : > { %p2835_p6 = pnand %p2834_p4, %p2828_p5 }
  0x3c   : > { %2838 = shalt.err (!%p2835_p6)
}
  0x3d   : > { %s2839_s20 = scalar_lea.vmem %s3094_s14, 128  ;;  %s2929_s11 = smov [#allocation2]  }
  0x3e   : > { %p2840_p8 = scmp.ne.s32.totalorder %s3094_s14, %s2839_s20  ;;  %s2844_s17 = sshll.u32 %s2929_s11, 4  ;;  %s2845_s17 = int_to_ptr.vmem [resolvable:$false] %s2844_s17 }
  0x3f   : > { %s2846_s21 = scalar_lea.vmem %s2845_s17, 256  ;;  %p2847_p3 = scmp.lt.s32.totalorder %s3094_s14, %s2845_s17 }
  0x40   : > { %p2842_p10 = pnand %p2840_p8, %p2826_p0  ;;  %p2848_p7 = scmp.lt.s32.totalorder %s2846_s21, %s2839_s20 }
  0x42   : > { %p2843_p13 = pneg %p2842_p10  ;;  %p2849_p9 = por %p2848_p7, %p2847_p3 }
  0x44   : > { %p2850_p2 = pnand %p2849_p9, %p2843_p13 }
  0x46   : > { %2853 = shalt.err (!%p2850_p2)
}
  0x47   : > { %2691 = dma.hbm_to_vmem [thread:$0]  (!%p3090_p11), %s3088_s16, 128, %s3094_s14, %s249_s29  }
  0x48   : > { %p3530_p5 = scmp.ne.s32.totalorder %s3525_s9, 0 }
  0x49   : > { %s3124_s10 = sand.u32 (!%p3530_p5), 1, %s2916_s25   ;;  %p3531_p0 = scmp.ne.s32.totalorder (!%p3530_p5), %s3523_s30, 0 }
  0x4a   : > { %268 = sbr.rel (%p3530_p5) target bundleno = 4353 (0x1101), region = 48  ;;  %s3516_s22 = sshll.u32 (!%p3530_p5), %s3124_s10, 3 }
  0x4b   : > { %s271_s12 = scalar_lea.sflag (!%p3530_p5), [#allocation3], %s3124_s10  ;;  %s274_s23 = scalar_lea.vmem (!%p3530_p5), [#allocation2], %s3516_s22 }
  0x51   : > { %2899 = dma.done.wait (%p3531_p0), %s271_s12, 128  }
  0x52   : > { %2901 = vsyncadd (%p3531_p0), %s271_s12, 4294967168  ;;  %p3532_p11 = scmp.eq.s32.totalorder %s3009_s28, 0 }
  0x54   : > { %2903 = dma.done.wait (%p3532_p11), [#allocation6], 256   ;;  %p3533_p1 = pmov %p3532_p11 }
  0x55   : > { %vm312_vm0 = vcmask 261120   ;;  %v3138_v0 = vld [vmem:[%s274_s23] sm:$0xff]  ;;  %v347_v9 = vld [vmem:[%s3507_s2 + $0x10] sm:$0xff]  ;;  %v2930_v10 = vmov 0.0|0.0   ;;  %v348_v12 = vld [vmem:[%s3507_s2 + $0x18] sm:$0xff]  ;;  %vm2931_vm1 = vmmov 0  }
  0x56   : > { %2905 = vsyncadd (%p3533_p1), [#allocation6], 4294967040  ;;  %v313_v1 = vsel %vm312_vm0, %v3138_v0, 0.0  ;;  %v345_v7 = vld [vmem:[%s3507_s2] sm:$0xff]  ;;  %v346_v8 = vld [vmem:[%s3507_s2 + $0x8] sm:$0xff]  ;;  %2634 = vmatprep.subr.bf16.mxu1 %v2930_v10  ;;  %v2932_v13 = vmov 0.0   ;;  %v3165_v14 = vpack.c.bf16 %v348_v12, %v347_v9 }
  0x57   : > { %314 = vadd.xlane.f32.xlu0 %v313_v1  ;;  %v3154_v11 = vpack.c.bf16 %v346_v8, %v345_v7  ;;  %2488 = vmatprep.mubr.msk.f32.mxu1 %vm2931_vm1, %v2932_v13  ;;  %v2368_v23 = vld [vmem:[%s3511_s6 + $0x4] ss:$0 sm:$0xff]  ;;  %v2369_v26 = vld [vmem:[%s3511_s6 + $0x7] ss:$0 sm:$0xff]  ;;  %v3182_v29 = vld [vmem:[%s3511_s6] ss:$0 sm:$0xff] }
  0x58   : > { %2501 = vmatprep.subr.mxu0 %v2932_v13  ;;  %2503 = vmatprep.mubr.msk.f32.mxu0 %vm2931_vm1, %v2932_v13  ;;  %s2933_s16 = smov 120   ;;  %s2934_s14 = smov 96   ;;  %vm430_vm4 = vcmask 64512   ;;  %v344_v40 = vld [vmem:[#allocation5] sm:$0xff]  ;;  %vm1100_vm5 = vcmask 130048   ;;  %vm1102_vm6 = vcmask 195584  }
  0x59   : > { %2636 = vmatpush3.bf16.msra.mxu1 %v3154_v11  ;;  %s2935_s15 = smov 88   ;;  %s2936_s29 = smov 80   ;;  %vm2188_vm11 = vcmask 523264  }
  0x5a   : > { %2637 = vmatprep.subr.bf16.mxu1 %v2930_v10  ;;  %s2937_s20 = smov 112   ;;  %s3522_s11 = smov 72  }
  0x5b   : > { %s3521_s17 = smov 104   ;;  %s3520_s21 = smov 64  }
  0x5c   : > { %s3519_s12 = smov 48   ;;  %s3518_s23 = smov 40  }
  0x5d   : > { %2639 = vmatpush3.bf16.msra.mxu1 %v3165_v14  ;;  %s3517_s30 = smov 56   ;;  %s2944_s22 = smov 8  }
  0x5e   : > { %2491 = vmatprep.subr.mxu1 %v2932_v13 }
  0xe4   : > { %v315_v2 = vpop.xlane.xlu0 %314 }
  0xe5   : > { %v317_v3 = vmul.f32 0.03125, %v315_v2 }
  0xe7   : > { %v318_v4 = vsub.f32 %v3138_v0, %v317_v3 }
  0xe9   : > { %v319_v5 = vmul.f32 %v318_v4, %v318_v4 }
  0xeb   : > { %v320_v6 = vsel %vm312_vm0, %v319_v5, 0.0 }
  0xec   : > { %321 = vadd.xlane.f32.xlu0 %v320_v6 }
 0x179   : > { %v322_v15 = vpop.xlane.xlu0 %321 }
 0x17a   : > { %v323_v16 = vmul.f32 0.032258064, %v322_v15 }
 0x17c   : > { %2752 = vrsqrt.f32 %v323_v16  ;;  %vm326_vm2 = vcmp.eq.f32.partialorder %v323_v16, inf  ;;  %v329_v19 = vand.u32 2147483648, %v323_v16  ;;  %vm328_vm3 = vcmp.eq.f32.partialorder %v323_v16, 0.0 }
 0x186   : > { %v2753_v17 = vpop.eup %2752 }
 0x187   : > { %v325_v18 = vmul.f32 %v2753_v17, %v323_v16 }
 0x189   : > { %v327_v20 = vsel %vm326_vm2, %v323_v16, %v325_v18 }
 0x18a   : > { %v330_v21 = vsel %vm328_vm3, %v329_v19, %v327_v20 }
 0x18b   : > { %v331_v22 = vadd.f32 1e-06, %v330_v21 }
 0x18d   : > { %2754 = vrcp.f32 %v331_v22 }
 0x197   : > { %v2755_v24 = vpop.eup %2754 }
 0x198   : > { %v337_v25 = vmul.f32 %v2755_v24, %v2368_v23 }
 0x19a   : > { %v338_v27 = vmul.f32 %v337_v25, %v318_v4 }
 0x19c   : > { %v343_v28 = vadd.f32 %v2369_v26, %v338_v27 }
 0x19e   : > { %2489 = vmatmul.mubr.msk.f32.vlgmr.msra.gmra.mrb[0].mxu1 %vm312_vm0, %v343_v28 }
 0x19f   : > { %2493 = vmatprep.mubr.msk.f32.mxu1 %vm2931_vm1, %v2932_v13 }
 0x271   : > { %v423_v30 = vpop.f32.mrb[0].mxu1 }
 0x272   : > { %v3185_v31 = vadd.f32 %v3182_v29, %v423_v30  ;;  %v2490_v32 = vpop.f32.mrb[1].mxu1 }
 0x274   : > { %592 = vrot.lane.b32.xlu0 %v3185_v31, %s2933_s16  ;;  %428 = vrot.lane.b32.xlu1 %v3185_v31, %s2934_s14 }
 0x278   : > { %594 = vrot.lane.b32.xlu1 %v3185_v31, %s2935_s15 }
 0x27c   : > { %759 = vrot.lane.b32.xlu1 %v3185_v31, %s2936_s29 }
 0x280   : > { %757 = vrot.lane.b32.xlu1 %v3185_v31, %s2937_s20 }
 0x284   : > { %924 = vrot.lane.b32.xlu1 %v3185_v31, %s3522_s11  ;;  %s2411_s11 = sshll.u32 %s3009_s28, 7  ;;  %s2265_s28 = scalar_lea.sflag [#allocation4], %s3124_s10 }
 0x288   : > { %922 = vrot.lane.b32.xlu1 %v3185_v31, %s3521_s17  ;;  %s3534_s17 = smov 72  }
 0x2e6   : > { %v429_v33 = vpop.permute.xlu1 %428  ;;  %v593_v35 = vpop.permute.xlu0 %592 }
 0x2e7   : > { %2492 = vmatpush3.xpose.msk.msra.mxu1 %vm430_vm4, %v429_v33 }
 0x2e8   : > { %2496 = vmatprep.subr.mxu1 %v2932_v13 }
 0x2ea   : > { %2494 = vmatmul.mubr.msk.f32.vlgmr.msra.gmra.mrb[2].mxu1 %vm430_vm4, %v3185_v31  ;;  %v595_v34 = vpop.permute.xlu1 %594 }
 0x2eb   : > { %2502 = vmatpush3.xpose.msk.msra.mxu0 %vm430_vm4, %v595_v34  ;;  %2498 = vmatprep.mubr.msk.f32.mxu1 %vm2931_vm1, %v2932_v13 }
 0x2ec   : > { %2511 = vmatprep.subr.mxu0 %v2932_v13 }
 0x2ee   : > { %2504 = vmatmul.mubr.msk.f32.vlgmr.msra.gmra.mrb[0].mxu0 %vm430_vm4, %v593_v35  ;;  %v760_v36 = vpop.permute.xlu1 %759  ;;  %v1104_v35 = vld [vmem:[%s3508_s3] sm:$0xff] }
 0x2ef   : > { %2512 = vmatpush3.xpose.msk.msra.mxu0 %vm430_vm4, %v760_v36  ;;  %2513 = vmatprep.mubr.msk.f32.mxu0 %vm2931_vm1, %v2932_v13  ;;  %v1105_v36 = vld [vmem:[%s3508_s3 + $0x8] sm:$0xff] }
 0x2f0   : > { %2521 = vmatprep.subr.mxu0 %v2932_v13 }
 0x2f2   : > { %v758_v37 = vpop.permute.xlu1 %757 }
 0x2f3   : > { %2514 = vmatmul.mubr.msk.f32.vlgmr.msra.gmra.mrb[2].mxu0 %vm430_vm4, %v758_v37  ;;  %v3264_v37 = vpack.c.bf16 %v1105_v36, %v1104_v35 }
 0x2f4   : > { %2523 = vmatprep.mubr.msk.f32.mxu0 %vm2931_vm1, %v2932_v13 }
 0x2f6   : > { %v925_v38 = vpop.permute.xlu1 %924 }
 0x2f7   : > { %2522 = vmatpush3.xpose.msk.msra.mxu0 %vm430_vm4, %v925_v38 }
 0x2f8   : > { %2640 = vmatprep.subr.bf16.mxu0 %v2930_v10 }
 0x2fa   : > { %v923_v39 = vpop.permute.xlu1 %922 }
 0x2fb   : > { %2524 = vmatmul.mubr.msk.f32.vlgmr.msra.gmra.mrb[4].mxu0 %vm430_vm4, %v923_v39  ;;  %v1107_v39 = vld [vmem:[%s3508_s3 + $0x18] sm:$0xff] }
 0x2fc   : > { %2539 = vmatprep.mubr.msk.f32.mxu0 %vm2931_vm1, %v2932_v13  ;;  %2642 = vmatpush3.bf16.msra.mxu0 %v3264_v37 }
 0x2fd   : > { %2643 = vmatprep.subr.bf16.mxu0 %v2930_v10 }
 0x3bd   : > { %v501_v41 = vpop.f32.mrb[2].mxu1 }
 0x3be   : > { %v502_v42 = vadd.f32 %v501_v41, %v344_v40  ;;  %v2495_v43 = vpop.f32.mrb[3].mxu1 }
 0x3c0   : > { %v505_v44 = vsel %vm430_vm4, %v502_v42, -inf }
 0x3c1   : > { %v666_v45 = vpop.f32.mrb[0].mxu0  ;;  %506 = vmax.xlane.f32.xlu1 %v505_v44 }
 0x3c2   : > { %v667_v46 = vadd.f32 %v666_v45, %v344_v40  ;;  %v2505_v47 = vpop.f32.mrb[1].mxu0 }
 0x3c4   : > { %v670_v48 = vsel %vm430_vm4, %v667_v46, -inf }
 0x3c5   : > { %671 = vmax.xlane.f32.xlu0 %v670_v48 }
 0x3c6   : > { %v831_v49 = vpop.f32.mrb[2].mxu0 }
 0x3c7   : > { %v832_v50 = vadd.f32 %v831_v49, %v344_v40  ;;  %v2515_v51 = vpop.f32.mrb[3].mxu0 }
 0x3c9   : > { %v835_v52 = vsel %vm430_vm4, %v832_v50, -inf }
 0x3ca   : > { %836 = vmax.xlane.f32.xlu1 %v835_v52 }
 0x3ce   : > { %v996_v53 = vpop.f32.mrb[4].mxu0 }
 0x3cf   : > { %v997_v54 = vadd.f32 %v996_v53, %v344_v40  ;;  %v2525_v55 = vpop.f32.mrb[5].mxu0  ;;  %v3290_v53 = vld [vmem:[%s3511_s6 + $0x1] ss:$0 sm:$0xff] }
 0x3d1   : > { %v1000_v56 = vsel %vm430_vm4, %v997_v54, -inf }
 0x3d2   : > { %1001 = vmax.xlane.f32.xlu0 %v1000_v56 }
 0x3db   : > { %516 = vrot.lane.b32.xlu1 %v3185_v31, %s3520_s21  ;;  %s2946_s21 = smov 24  }
 0x44e   : > { %v507_v57 = vpop.xlane.xlu1 %506 }
 0x44f   : > { %v508_v58 = vsub.f32 %v502_v42, %v507_v57 }
 0x451   : > { %v509_v59 = vmul.f32 1.442695, %v508_v58 }
 0x452   : > { %v672_v60 = vpop.xlane.xlu0 %671 }
 0x453   : > { %2756 = vpow2.f32 %v509_v59  ;;  %v673_v61 = vsub.f32 %v667_v46, %v672_v60 }
 0x455   : > { %v674_v62 = vmul.f32 1.442695, %v673_v61 }
 0x457   : > { %2758 = vpow2.f32 %v674_v62  ;;  %v837_v63 = vpop.xlane.xlu1 %836 }
 0x458   : > { %v838_v1 = vsub.f32 %v832_v50, %v837_v63 }
 0x45a   : > { %v839_v2 = vmul.f32 1.442695, %v838_v1 }
 0x45b   : > { %v517_v3 = vpop.permute.xlu1 %516 }
 0x45c   : > { %2760 = vpow2.f32 %v839_v2  ;;  %2497 = vmatpush3.msra.mxu1 %v517_v3 }
 0x45d   : > { %v2757_v4 = vpop.eup %2756  ;;  %2506 = vmatprep.subr.mxu1 %v2932_v13 }
 0x45e   : > { %v511_v5 = vsel %vm430_vm4, %v2757_v4, 0.0 }
 0x45f   : > { %v1002_v6 = vpop.xlane.xlu0 %1001  ;;  %512 = vadd.xlane.f32.xlu1 %v511_v5 }
 0x460   : > { %v1003_v7 = vsub.f32 %v997_v54, %v1002_v6 }
 0x461   : > { %v2759_v8 = vpop.eup %2758 }
 0x462   : > { %v1004_v9 = vmul.f32 1.442695, %v1003_v7  ;;  %v676_v12 = vsel %vm430_vm4, %v2759_v8, 0.0 }
 0x463   : > { %677 = vadd.xlane.f32.xlu0 %v676_v12 }
 0x464   : > { %2762 = vpow2.f32 %v1004_v9 }
 0x466   : > { %v2761_v15 = vpop.eup %2760 }
 0x467   : > { %v841_v16 = vsel %vm430_vm4, %v2761_v15, 0.0 }
 0x468   : > { %842 = vadd.xlane.f32.xlu1 %v841_v16 }
 0x46e   : > { %v2763_v17 = vpop.eup %2762 }
 0x46f   : > { %v1006_v18 = vsel %vm430_vm4, %v2763_v17, 0.0 }
 0x470   : > { %1007 = vadd.xlane.f32.xlu0 %v1006_v18 }
 0x479   : > { %846 = vrot.lane.b32.xlu1 %v3185_v31, %s3519_s12  ;;  %s3535_s12 = smov 104  }
 0x47d   : > { %1011 = vrot.lane.b32.xlu1 %v3185_v31, %s3518_s23  ;;  %s2945_s23 = smov 16  }
 0x486   : > { %681 = vrot.lane.b32.xlu0 %v3185_v31, %s3517_s30 }
 0x4ec   : > { %v513_v19 = vpop.xlane.xlu1 %512 }
 0x4ed   : > { %2764 = vrcp.f32 %v513_v19 }
 0x4f0   : > { %v678_v20 = vpop.xlane.xlu0 %677 }
 0x4f1   : > { %2766 = vrcp.f32 %v678_v20 }
 0x4f5   : > { %v843_v21 = vpop.xlane.xlu1 %842 }
 0x4f6   : > { %2768 = vrcp.f32 %v843_v21 }
 0x4f7   : > { %v2765_v22 = vpop.eup %2764 }
 0x4f8   : > { %v515_v23 = vmul.f32 %v2765_v22, %v2757_v4 }
 0x4f9   : > { %v847_v27 = vpop.permute.xlu1 %846 }
 0x4fa   : > { %2499 = vmatmul.mubr.msk.f32.vlgmr.msra.gmra.mrb[4].mxu1 %vm430_vm4, %v515_v23 }
 0x4fb   : > { %2508 = vmatprep.mubr.msk.f32.mxu1 %vm2931_vm1, %v2932_v13  ;;  %v2767_v25 = vpop.eup %2766 }
 0x4fc   : > { %v680_v26 = vmul.f32 %v2767_v25, %v2759_v8  ;;  %v2386_v8 = vld [vmem:[%s3511_s6 + $0x5] ss:$0 sm:$0xff] }
 0x4fd   : > { %v1008_v24 = vpop.xlane.xlu0 %1007  ;;  %v1012_v32 = vpop.permute.xlu1 %1011 }
 0x4fe   : > { %2770 = vrcp.f32 %v1008_v24 }
 0x500   : > { %v2769_v30 = vpop.eup %2768 }
 0x501   : > { %v682_v28 = vpop.permute.xlu0 %681  ;;  %v845_v31 = vmul.f32 %v2769_v30, %v2761_v15  ;;  %v2387_v15 = vld [vmem:[%s3511_s6 + $0x8] ss:$0 sm:$0xff] }
 0x502   : > { %2507 = vmatpush3.msra.mxu1 %v682_v28 }
 0x503   : > { %2509 = vmatmul.mubr.msk.f32.vlgmr.msra.gmra.mrb[6].mxu1 %vm430_vm4, %v680_v26  ;;  %2516 = vmatprep.subr.mxu1 %v2932_v13 }
 0x504   : > { %2517 = vmatpush3.msra.mxu1 %v847_v27  ;;  %2518 = vmatprep.mubr.msk.f32.mxu1 %vm2931_vm1, %v2932_v13  ;;  %v1220_v27 = vld [vmem:[#allocation5 + $0x8] sm:$0xff] }
 0x505   : > { %2526 = vmatprep.subr.mxu1 %v2932_v13 }
 0x507   : > { %2519 = vmatmul.mubr.msk.f32.vlgmr.msra.gmra.mrb[8].mxu1 %vm430_vm4, %v845_v31 }
 0x508   : > { %v2771_v33 = vpop.eup %2770  ;;  %2527 = vmatpush3.msra.mxu1 %v1012_v32  ;;  %2528 = vmatprep.mubr.msk.f32.mxu1 %vm2931_vm1, %v2932_v13 }
 0x509   : > { %v1010_v34 = vmul.f32 %v2771_v33, %v2763_v17  ;;  %2646 = vmatprep.subr.bf16.mxu1 %v2930_v10 }
 0x50b   : > { %2529 = vmatmul.mubr.msk.f32.vlgmr.msra.gmra.mrb[10].mxu1 %vm430_vm4, %v1010_v34 }
 0x50c   : > { %2648 = vmatpush3.bf16.msra.mxu1 %v3154_v11  ;;  %2550 = vmatprep.mubr.msk.f32.mxu1 %vm2931_vm1, %v2932_v13 }
 0x50d   : > { %2649 = vmatprep.subr.bf16.mxu1 %v2930_v10 }
 0x510   : > { %2651 = vmatpush3.bf16.msra.mxu1 %v3165_v14  ;;  %v1106_v14 = vld [vmem:[%s3508_s3 + $0x10] sm:$0xff] }
 0x511   : > { %2558 = vmatprep.subr.mxu1 %v2932_v13  ;;  %v3274_v40 = vpack.c.bf16 %v1107_v39, %v1106_v14 }
 0x513   : > { %2645 = vmatpush3.bf16.msra.mxu0 %v3274_v40 }
 0x514   : > { %2553 = vmatprep.subr.mxu0 %v2932_v13 }
 0x5cd   : > { %v588_v11 = vpop.f32.mrb[4].mxu1 }
 0x5ce   : > { %v2500_v38 = vpop.f32.mrb[5].mxu1 }
 0x5d6   : > { %v753_v41 = vpop.f32.mrb[6].mxu1 }
 0x5d7   : > { %1088 = vrot.lane.b32.xlu0 %v753_v41, %s2944_s22  ;;  %v2510_v42 = vpop.f32.mrb[7].mxu1 }
 0x5da   : > { %v918_v43 = vpop.f32.mrb[8].mxu1 }
 0x5db   : > { %1092 = vrot.lane.b32.xlu1 %v918_v43, %s2945_s23  ;;  %v2520_v44 = vpop.f32.mrb[9].mxu1 }
 0x5de   : > { %v1083_v45 = vpop.f32.mrb[10].mxu1 }
 0x5df   : > { %1096 = vrot.lane.b32.xlu0 %v1083_v45, %s2946_s21  ;;  %v2530_v46 = vpop.f32.mrb[11].mxu1 }
 0x649   : > { %v1089_v47 = vpop.permute.xlu0 %1088 }
 0x64a   : > { %v1099_v49 = vsel %vm430_vm4, %v588_v11, %v1089_v47 }
 0x64d   : > { %v1093_v48 = vpop.permute.xlu1 %1092 }
 0x64e   : > { %v1101_v50 = vsel %vm1100_vm5, %v1099_v49, %v1093_v48 }
 0x651   : > { %v1097_v51 = vpop.permute.xlu0 %1096 }
 0x652   : > { %v1103_v52 = vsel %vm1102_vm6, %v1101_v50, %v1097_v51 }
 0x653   : > { %2540 = vmatmul.mubr.msk.f32.vlgmr.msra.gmra.mrb[6].mxu0 %vm312_vm0, %v1103_v52 }
 0x654   : > { %2555 = vmatprep.mubr.msk.f32.mxu0 %vm2931_vm1, %v2932_v13 }
 0x726   : > { %v1182_v54 = vpop.f32.mrb[6].mxu0 }
 0x727   : > { %v1183_v55 = vadd.f32 %v3290_v53, %v1182_v54  ;;  %v2541_v56 = vpop.f32.mrb[7].mxu0 }
 0x729   : > { %v3294_v57 = vadd.f32 %v1183_v55, %v3138_v0 }
 0x72b   : > { %v1189_v58 = vsel %vm312_vm0, %v3294_v57, 0.0 }
 0x72c   : > { %1190 = vadd.xlane.f32.xlu1 %v1189_v58 }
 0x7b9   : > { %v1191_v59 = vpop.xlane.xlu1 %1190 }
 0x7ba   : > { %v1192_v60 = vmul.f32 0.03125, %v1191_v59 }
 0x7bc   : > { %v1193_v61 = vsub.f32 %v3294_v57, %v1192_v60 }
 0x7be   : > { %v1194_v62 = vmul.f32 %v1193_v61, %v1193_v61 }
 0x7c0   : > { %v1195_v63 = vsel %vm312_vm0, %v1194_v62, 0.0 }
 0x7c1   : > { %1196 = vadd.xlane.f32.xlu0 %v1195_v63 }
 0x84e   : > { %v1197_v1 = vpop.xlane.xlu0 %1196 }
 0x84f   : > { %v1198_v2 = vmul.f32 0.032258064, %v1197_v1 }
 0x851   : > { %2772 = vrsqrt.f32 %v1198_v2  ;;  %vm1201_vm7 = vcmp.eq.f32.partialorder %v1198_v2, inf  ;;  %v1204_v0 = vand.u32 2147483648, %v1198_v2  ;;  %vm1203_vm8 = vcmp.eq.f32.partialorder %v1198_v2, 0.0 }
 0x85b   : > { %v2773_v3 = vpop.eup %2772 }
 0x85c   : > { %v1200_v4 = vmul.f32 %v2773_v3, %v1198_v2 }
 0x85e   : > { %v1202_v5 = vsel %vm1201_vm7, %v1198_v2, %v1200_v4 }
 0x85f   : > { %v1205_v6 = vsel %vm1203_vm8, %v1204_v0, %v1202_v5 }
 0x860   : > { %v1206_v7 = vadd.f32 1e-06, %v1205_v6 }
 0x862   : > { %2774 = vrcp.f32 %v1206_v7 }
 0x86c   : > { %v2775_v9 = vpop.eup %2774 }
 0x86d   : > { %v1212_v12 = vmul.f32 %v2775_v9, %v2386_v8 }
 0x86f   : > { %v1213_v16 = vmul.f32 %v1212_v12, %v1193_v61 }
 0x871   : > { %v1218_v17 = vadd.f32 %v2387_v15, %v1213_v16 }
 0x873   : > { %2551 = vmatmul.mubr.msk.f32.vlgmr.msra.gmra.mrb[12].mxu1 %vm312_vm0, %v1218_v17 }
 0x874   : > { %2560 = vmatprep.mubr.msk.f32.mxu1 %vm2931_vm1, %v2932_v13 }
 0x946   : > { %v1299_v18 = vpop.f32.mrb[12].mxu1 }
 0x947   : > { %v3310_v19 = vadd.f32 %v3182_v29, %v1299_v18  ;;  %v2552_v20 = vpop.f32.mrb[13].mxu1 }
 0x949   : > { %1469 = vrot.lane.b32.xlu1 %v3310_v19, %s2935_s15  ;;  %1304 = vrot.lane.b32.xlu0 %v3310_v19, %s2934_s14  ;;  %s3537_s14 = smov 48   ;;  %s3538_s15 = smov 40  }
 0x94d   : > { %1467 = vrot.lane.b32.xlu1 %v3310_v19, %s2933_s16  ;;  %1634 = vrot.lane.b32.xlu0 %v3310_v19, %s2936_s29  ;;  %s3536_s16 = smov 64   ;;  %s3539_s29 = smov 56  }
 0x951   : > { %1632 = vrot.lane.b32.xlu1 %v3310_v19, %s2937_s20  ;;  %1799 = vrot.lane.b32.xlu0 %v3310_v19, %s3534_s17  ;;  %s3540_s17 = sshll.u32 %s3124_s10, 3 }
 0x955   : > { %1797 = vrot.lane.b32.xlu1 %v3310_v19, %s3535_s12  ;;  %s308_s12 = scalar_lea.vmem [#allocation7], %s3540_s17 }
 0x9bb   : > { %v1470_v29 = vpop.permute.xlu1 %1469  ;;  %v1305_v21 = vpop.permute.xlu0 %1304 }
 0x9bc   : > { %2554 = vmatpush3.xpose.msk.msra.mxu0 %vm430_vm4, %v1305_v21 }
 0x9bd   : > { %2563 = vmatprep.subr.mxu0 %v2932_v13 }
 0x9bf   : > { %v1468_v22 = vpop.permute.xlu1 %1467  ;;  %2556 = vmatmul.mubr.msk.f32.vlgmr.msra.gmra.mrb[8].mxu0 %vm430_vm4, %v3310_v19  ;;  %v1635_v23 = vpop.permute.xlu0 %1634 }
 0x9c0   : > { %2564 = vmatpush3.xpose.msk.msra.mxu0 %vm430_vm4, %v1470_v29  ;;  %2565 = vmatprep.mubr.msk.f32.mxu0 %vm2931_vm1, %v2932_v13 }
 0x9c1   : > { %2573 = vmatprep.subr.mxu0 %v2932_v13 }
 0x9c3   : > { %2566 = vmatmul.mubr.msk.f32.vlgmr.msra.gmra.mrb[10].mxu0 %vm430_vm4, %v1468_v22  ;;  %v1633_v24 = vpop.permute.xlu1 %1632  ;;  %v1800_v25 = vpop.permute.xlu0 %1799 }
 0x9c4   : > { %2574 = vmatpush3.xpose.msk.msra.mxu0 %vm430_vm4, %v1635_v23  ;;  %2575 = vmatprep.mubr.msk.f32.mxu0 %vm2931_vm1, %v2932_v13 }
 0x9c5   : > { %2583 = vmatprep.subr.mxu0 %v2932_v13 }
 0x9c7   : > { %2576 = vmatmul.mubr.msk.f32.vlgmr.msra.gmra.mrb[12].mxu0 %vm430_vm4, %v1633_v24  ;;  %v1798_v26 = vpop.permute.xlu1 %1797 }
 0x9c8   : > { %2584 = vmatpush3.xpose.msk.msra.mxu0 %vm430_vm4, %v1800_v25  ;;  %2585 = vmatprep.mubr.msk.f32.mxu0 %vm2931_vm1, %v2932_v13 }
 0x9c9   : > { %2652 = vmatprep.subr.bf16.mxu0 %v2930_v10 }
 0x9cb   : > { %2586 = vmatmul.mubr.msk.f32.vlgmr.msra.gmra.mrb[14].mxu0 %vm430_vm4, %v1798_v26 }
 0x9cc   : > { %2654 = vmatpush3.bf16.msra.mxu0 %v3264_v37  ;;  %2601 = vmatprep.mubr.msk.f32.mxu0 %vm2931_vm1, %v2932_v13 }
 0x9cd   : > { %2655 = vmatprep.subr.bf16.mxu0 %v2930_v10 }
 0x9d0   : > { %2657 = vmatpush3.bf16.msra.mxu0 %v3274_v40 }
 0x9d1   : > { %2664 = vmatprep.subr.bf16.mxu0 %v2930_v10 }
 0xa92   : > { %v1376_v28 = vpop.f32.mrb[8].mxu0 }
 0xa93   : > { %v1377_v30 = vadd.f32 %v1376_v28, %v1220_v27  ;;  %v2557_v31 = vpop.f32.mrb[9].mxu0 }
 0xa95   : > { %v1380_v32 = vsel %vm430_vm4, %v1377_v30, -inf }
 0xa96   : > { %1381 = vmax.xlane.f32.xlu0 %v1380_v32  ;;  %v1541_v33 = vpop.f32.mrb[10].mxu0 }
 0xa97   : > { %v1542_v34 = vadd.f32 %v1541_v33, %v1220_v27  ;;  %v2567_v35 = vpop.f32.mrb[11].mxu0 }
 0xa99   : > { %v1545_v36 = vsel %vm430_vm4, %v1542_v34, -inf }
 0xa9a   : > { %1546 = vmax.xlane.f32.xlu1 %v1545_v36  ;;  %v1706_v37 = vpop.f32.mrb[12].mxu0 }
 0xa9b   : > { %v1707_v11 = vadd.f32 %v1706_v37, %v1220_v27  ;;  %v2577_v38 = vpop.f32.mrb[13].mxu0 }
 0xa9d   : > { %v1710_v14 = vsel %vm430_vm4, %v1707_v11, -inf }
 0xa9e   : > { %1711 = vmax.xlane.f32.xlu0 %v1710_v14  ;;  %v1871_v39 = vpop.f32.mrb[14].mxu0 }
 0xa9f   : > { %v1872_v40 = vadd.f32 %v1871_v39, %v1220_v27  ;;  %v2587_v41 = vpop.f32.mrb[15].mxu0 }
 0xaa1   : > { %v1875_v42 = vsel %vm430_vm4, %v1872_v40, -inf }
 0xaa2   : > { %1876 = vmax.xlane.f32.xlu0 %v1875_v42 }
 0xaab   : > { %1391 = vrot.lane.b32.xlu1 %v3310_v19, %s3536_s16  ;;  %s2278_s16 = sshll.u32 %s308_s12, 4  ;;  %s3462_s16 = int_to_ptr.vmem [resolvable:$true] %s2278_s16 }
 0xaac   : > { %s2854_s20 = scalar_lea.vmem %s3462_s16, 128 }
 0xaad   : > { %p2855_p4 = scmp.ne.s32.totalorder %s3462_s16, %s2854_s20 }
 0xaaf   : > { %p2856_p6 = pnand %p2855_p4, %p3079_p12 }
 0xab1   : > { %p2857_p8 = pneg %p2856_p6 }
 0xb23   : > { %v1382_v43 = vpop.xlane.xlu0 %1381 }
 0xb24   : > { %v1383_v44 = vsub.f32 %v1377_v30, %v1382_v43 }
 0xb26   : > { %v1384_v45 = vmul.f32 1.442695, %v1383_v44  ;;  %v2095_v44 = vld [vmem:[%s3509_s4 + $0x18] sm:$0xff] }
 0xb27   : > { %v1547_v46 = vpop.xlane.xlu1 %1546 }
 0xb28   : > { %2776 = vpow2.f32 %v1384_v45  ;;  %v1548_v47 = vsub.f32 %v1542_v34, %v1547_v46  ;;  %v2175_v46 = vld [vmem:[%s3510_s5] sm:$0xff] }
 0xb2a   : > { %v1549_v48 = vmul.f32 1.442695, %v1548_v47  ;;  %v2176_v47 = vld [vmem:[%s3510_s5 + $0x8] sm:$0xff] }
 0xb2b   : > { %v1392_v49 = vpop.permute.xlu1 %1391  ;;  %v1712_v50 = vpop.xlane.xlu0 %1711 }
 0xb2c   : > { %2778 = vpow2.f32 %v1549_v48  ;;  %v1713_v51 = vsub.f32 %v1707_v11, %v1712_v50  ;;  %2559 = vmatpush3.msra.mxu1 %v1392_v49  ;;  %v2177_v48 = vld [vmem:[%s3510_s5 + $0x10] sm:$0xff]  ;;  %v2665_v49 = vpack.c.bf16 %v2176_v47, %v2175_v46  ;;  %v2178_v50 = vld [vmem:[%s3510_s5 + $0x18] sm:$0xff] }
 0xb2d   : > { %2568 = vmatprep.subr.mxu1 %v2932_v13 }
 0xb2e   : > { %v1714_v52 = vmul.f32 1.442695, %v1713_v51  ;;  %v2668_v51 = vpack.c.bf16 %v2178_v50, %v2177_v48 }
 0xb2f   : > { %v1877_v54 = vpop.xlane.xlu0 %1876 }
 0xb30   : > { %2780 = vpow2.f32 %v1714_v52  ;;  %v1878_v55 = vsub.f32 %v1872_v40, %v1877_v54  ;;  %v2179_v52 = vld [vmem:[%s3510_s5 + $0x20] sm:$0xff]  ;;  %v2180_v54 = vld [vmem:[%s3510_s5 + $0x28] sm:$0xff] }
 0xb32   : > { %v2777_v56 = vpop.eup %2776  ;;  %v1879_v58 = vmul.f32 1.442695, %v1878_v55  ;;  %v2671_v55 = vpack.c.bf16 %v2180_v54, %v2179_v52 }
 0xb33   : > { %v1386_v59 = vsel %vm430_vm4, %v2777_v56, 0.0 }
 0xb34   : > { %2782 = vpow2.f32 %v1879_v58  ;;  %1387 = vadd.xlane.f32.xlu1 %v1386_v59 }
 0xb36   : > { %v2779_v60 = vpop.eup %2778 }
 0xb37   : > { %v1551_v61 = vsel %vm430_vm4, %v2779_v60, 0.0 }
 0xb38   : > { %1552 = vadd.xlane.f32.xlu0 %v1551_v61 }
 0xb3a   : > { %v2781_v62 = vpop.eup %2780 }
 0xb3b   : > { %v1716_v63 = vsel %vm430_vm4, %v2781_v62, 0.0 }
 0xb3c   : > { %1717 = vadd.xlane.f32.xlu1 %v1716_v63 }
 0xb3e   : > { %v2783_v1 = vpop.eup %2782 }
 0xb3f   : > { %v1881_v2 = vsel %vm430_vm4, %v2783_v1, 0.0 }
 0xb40   : > { %1882 = vadd.xlane.f32.xlu0 %v1881_v2  ;;  %v2404_v2 = vld [vmem:[%s3511_s6 + $0x6] ss:$0 sm:$0xff] }
 0xb4d   : > { %1721 = vrot.lane.b32.xlu1 %v3310_v19, %s3537_s14 }
 0xb51   : > { %1886 = vrot.lane.b32.xlu1 %v3310_v19, %s3538_s15 }
 0xb56   : > { %1556 = vrot.lane.b32.xlu0 %v3310_v19, %s3539_s29  ;;  %s3460_s29 = scalar_lea.hbm %s3512_s7, %s2411_s11 }
 0xbc1   : > { %v1388_v3 = vpop.xlane.xlu1 %1387 }
 0xbc2   : > { %2784 = vrcp.f32 %v1388_v3 }
 0xbc5   : > { %v1553_v4 = vpop.xlane.xlu0 %1552 }
 0xbc6   : > { %2786 = vrcp.f32 %v1553_v4 }
 0xbc9   : > { %v1718_v0 = vpop.xlane.xlu1 %1717 }
 0xbca   : > { %2788 = vrcp.f32 %v1718_v0 }
 0xbcc   : > { %v2785_v5 = vpop.eup %2784 }
 0xbcd   : > { %v1390_v6 = vmul.f32 %v2785_v5, %v2777_v56  ;;  %v1883_v7 = vpop.xlane.xlu0 %1882  ;;  %v1722_v12 = vpop.permute.xlu1 %1721 }
 0xbce   : > { %2790 = vrcp.f32 %v1883_v7  ;;  %v2182_v7 = vld [vmem:[%s3510_s5 + $0x38] sm:$0xff] }
 0xbcf   : > { %2561 = vmatmul.mubr.msk.f32.vlgmr.msra.gmra.mrb[14].mxu1 %vm430_vm4, %v1390_v6  ;;  %v2181_v6 = vld [vmem:[%s3510_s5 + $0x30] sm:$0xff] }
 0xbd0   : > { %v2787_v8 = vpop.eup %2786  ;;  %2570 = vmatprep.mubr.msk.f32.mxu1 %vm2931_vm1, %v2932_v13 }
 0xbd1   : > { %v1555_v9 = vmul.f32 %v2787_v8, %v2779_v60  ;;  %v1557_v15 = vpop.permute.xlu0 %1556  ;;  %v1887_v18 = vpop.permute.xlu1 %1886  ;;  %v2674_v8 = vpack.c.bf16 %v2182_v7, %v2181_v6 }
 0xbd2   : > { %2569 = vmatpush3.msra.mxu1 %v1557_v15 }
 0xbd3   : > { %2571 = vmatmul.mubr.msk.f32.vlgmr.msra.gmra.mrb[16].mxu1 %vm430_vm4, %v1555_v9  ;;  %2578 = vmatprep.subr.mxu1 %v2932_v13  ;;  %v2406_v9 = vld [vmem:[%s3511_s6 + $0x2] ss:$0 sm:$0xff] }
 0xbd4   : > { %v2789_v16 = vpop.eup %2788  ;;  %2579 = vmatpush3.msra.mxu1 %v1722_v12  ;;  %2580 = vmatprep.mubr.msk.f32.mxu1 %vm2931_vm1, %v2932_v13 }
 0xbd5   : > { %v1720_v17 = vmul.f32 %v2789_v16, %v2781_v62  ;;  %2588 = vmatprep.subr.mxu1 %v2932_v13 }
 0xbd7   : > { %2581 = vmatmul.mubr.msk.f32.vlgmr.msra.gmra.mrb[18].mxu1 %vm430_vm4, %v1720_v17 }
 0xbd8   : > { %v2791_v19 = vpop.eup %2790  ;;  %2589 = vmatpush3.msra.mxu1 %v1887_v18  ;;  %2590 = vmatprep.mubr.msk.f32.mxu1 %vm2931_vm1, %v2932_v13  ;;  %v2408_v18 = vld [vmem:[%s3511_s6 + $0x3] ss:$0 sm:$0xff] }
 0xbd9   : > { %v1885_v20 = vmul.f32 %v2791_v19, %v2783_v1  ;;  %2658 = vmatprep.subr.bf16.mxu1 %v2930_v10 }
 0xbdb   : > { %2591 = vmatmul.mubr.msk.f32.vlgmr.msra.gmra.mrb[20].mxu1 %vm430_vm4, %v1885_v20 }
 0xbdc   : > { %2612 = vmatprep.mubr.msk.f32.mxu1 %vm2931_vm1, %v2932_v13 }
 0xca2   : > { %v1463_v29 = vpop.f32.mrb[14].mxu1 }
 0xca3   : > { %v2562_v21 = vpop.f32.mrb[15].mxu1 }
 0xca6   : > { %v1628_v22 = vpop.f32.mrb[16].mxu1 }
 0xca7   : > { %1963 = vrot.lane.b32.xlu0 %v1628_v22, %s2944_s22  ;;  %v2572_v23 = vpop.f32.mrb[17].mxu1  ;;  %s2947_s22 = smov [#allocation7]  }
 0xcaa   : > { %v1793_v24 = vpop.f32.mrb[18].mxu1 }
 0xcab   : > { %1967 = vrot.lane.b32.xlu1 %v1793_v24, %s2945_s23  ;;  %v2582_v25 = vpop.f32.mrb[19].mxu1  ;;  %s2858_s23 = sshll.u32 %s2947_s22, 4  ;;  %s2859_s23 = int_to_ptr.vmem [resolvable:$false] %s2858_s23 }
 0xcac   : > { %p2861_p10 = scmp.lt.s32.totalorder %s3462_s16, %s2859_s23 }
 0xcae   : > { %v1958_v26 = vpop.f32.mrb[20].mxu1 }
 0xcaf   : > { %1971 = vrot.lane.b32.xlu0 %v1958_v26, %s2946_s21  ;;  %v2592_v27 = vpop.f32.mrb[21].mxu1  ;;  %s2860_s21 = scalar_lea.vmem %s2859_s23, 256 }
 0xcb0   : > { %p2862_p13 = scmp.lt.s32.totalorder %s2860_s21, %s2854_s20 }
 0xcb2   : > { %p2863_p3 = por %p2862_p13, %p2861_p10 }
 0xcb4   : > { %p2864_p7 = pnand %p2863_p3, %p2857_p8 }
 0xd19   : > { %v1964_v28 = vpop.permute.xlu0 %1963 }
 0xd1a   : > { %v1974_v31 = vsel %vm430_vm4, %v1463_v29, %v1964_v28 }
 0xd1d   : > { %v1968_v30 = vpop.permute.xlu1 %1967 }
 0xd1e   : > { %v1975_v32 = vsel %vm1100_vm5, %v1974_v31, %v1968_v30 }
 0xd21   : > { %v1972_v33 = vpop.permute.xlu0 %1971 }
 0xd22   : > { %v1976_v34 = vsel %vm1102_vm6, %v1975_v32, %v1972_v33 }
 0xd23   : > { %2602 = vmatmul.mubr.msk.f32.vlgmr.msra.gmra.mrb[16].mxu0 %vm312_vm0, %v1976_v34 }
 0xd24   : > { %2631 = vmatprep.mubr.msk.f32.mxu0 %vm2931_vm1, %v2932_v13  ;;  %v2092_v13 = vld [vmem:[%s3509_s4] sm:$0xff]  ;;  %2666 = vmatpush3.bf16.msra.mxu0 %v2665_v49 }
 0xd25   : > { %2667 = vmatprep.subr.bf16.mxu0 %v2930_v10 }
 0xd28   : > { %2669 = vmatpush3.bf16.msra.mxu0 %v2668_v51 }
 0xd29   : > { %2670 = vmatprep.subr.bf16.mxu0 %v2930_v10 }
 0xd2c   : > { %2672 = vmatpush3.bf16.msra.mxu0 %v2671_v55 }
 0xd2d   : > { %2673 = vmatprep.subr.bf16.mxu0 %v2930_v10 }
 0xd30   : > { %2675 = vmatpush3.bf16.msra.mxu0 %v2674_v8 }
 0xdf6   : > { %v2055_v35 = vpop.f32.mrb[16].mxu0 }
 0xdf7   : > { %v2056_v36 = vadd.f32 %v3290_v53, %v2055_v35  ;;  %v2603_v37 = vpop.f32.mrb[17].mxu0  ;;  %v2093_v53 = vld [vmem:[%s3509_s4 + $0x8] sm:$0xff] }
 0xdf8   : > { %v2659_v43 = vpack.c.bf16 %v2093_v53, %v2092_v13 }
 0xdf9   : > { %v3394_v11 = vadd.f32 %v2056_v36, %v3294_v57  ;;  %v2094_v57 = vld [vmem:[%s3509_s4 + $0x10] sm:$0xff] }
 0xdfa   : > { %2660 = vmatpush3.bf16.msra.mxu1 %v2659_v43  ;;  %v2662_v45 = vpack.c.bf16 %v2095_v44, %v2094_v57 }
 0xdfb   : > { %v2062_v38 = vsel %vm312_vm0, %v3394_v11, 0.0  ;;  %2661 = vmatprep.subr.bf16.mxu1 %v2930_v10  ;;  %v2405_v10 = vld [vmem:[%s3511_s6 + $0x9] ss:$0 sm:$0xff] }
 0xdfc   : > { %2063 = vadd.xlane.f32.xlu1 %v2062_v38 }
 0xdfe   : > { %2663 = vmatpush3.bf16.msra.mxu1 %v2662_v45 }
 0xe89   : > { %v2064_v14 = vpop.xlane.xlu1 %2063 }
 0xe8a   : > { %v2065_v39 = vmul.f32 0.03125, %v2064_v14 }
 0xe8c   : > { %v2066_v40 = vsub.f32 %v3394_v11, %v2065_v39 }
 0xe8e   : > { %v2067_v41 = vmul.f32 %v2066_v40, %v2066_v40 }
 0xe90   : > { %v2068_v42 = vsel %vm312_vm0, %v2067_v41, 0.0 }
 0xe91   : > { %2069 = vadd.xlane.f32.xlu0 %v2068_v42 }
 0xf1e   : > { %v2070_v56 = vpop.xlane.xlu0 %2069 }
 0xf1f   : > { %v2071_v58 = vmul.f32 0.032258064, %v2070_v56 }
 0xf21   : > { %2792 = vrsqrt.f32 %v2071_v58  ;;  %vm2074_vm9 = vcmp.eq.f32.partialorder %v2071_v58, inf  ;;  %v2077_v61 = vand.u32 2147483648, %v2071_v58  ;;  %vm2076_vm10 = vcmp.eq.f32.partialorder %v2071_v58, 0.0 }
 0xf2b   : > { %v2793_v59 = vpop.eup %2792 }
 0xf2c   : > { %v2073_v60 = vmul.f32 %v2793_v59, %v2071_v58 }
 0xf2e   : > { %v2075_v62 = vsel %vm2074_vm9, %v2071_v58, %v2073_v60 }
 0xf2f   : > { %v2078_v63 = vsel %vm2076_vm10, %v2077_v61, %v2075_v62 }
 0xf30   : > { %v2079_v1 = vadd.f32 1e-06, %v2078_v63 }
 0xf32   : > { %2794 = vrcp.f32 %v2079_v1 }
 0xf3c   : > { %v2795_v3 = vpop.eup %2794 }
 0xf3d   : > { %v2085_v4 = vmul.f32 %v2795_v3, %v2404_v2 }
 0xf3f   : > { %v2086_v0 = vmul.f32 %v2085_v4, %v2066_v40 }
 0xf41   : > { %v2091_v5 = vadd.f32 %v2405_v10, %v2086_v0 }
 0xf43   : > { %2613 = vmatmul.mubr.msk.f32.vlgmr.msra.gmra.mrb[22].mxu1 %vm312_vm0, %v2091_v5 }
0x1016   : > { %v2170_v12 = vpop.f32.mrb[22].mxu1 }
0x1017   : > { %v2171_v15 = vadd.f32 %v2406_v9, %v2170_v12  ;;  %v2614_v16 = vpop.f32.mrb[23].mxu1 }
0x1019   : > { %v2174_v17 = vmax.f32 %v2171_v15, 0.0 }
0x101b   : > { %2632 = vmatmul.mubr.msk.f32.vlgmr.msra.gmra.mrb[18].mxu0 %vm2188_vm11, %v2174_v17 }
0x10ee   : > { %v2258_v19 = vpop.f32.mrb[18].mxu0 }
0x10ef   : > { %v2259_v20 = vadd.f32 %v2408_v18, %v2258_v19  ;;  %v2633_v29 = vpop.f32.mrb[19].mxu0 }
0x10f1   : > { %v2262_v21 = vadd.f32 %v2259_v20, %v3394_v11 }
0x10f3   : > { %2263 = vst.msk [vmem:[%s308_s12] sm:$0xff] %vm312_vm0, %v2262_v21 }
0x10f4   : > { %2867 = shalt.err (!%p2864_p7)
}
0x10f5   : > { %s2868_s10 = scalar_lea.hbm %s3460_s29, 128  ;;  %s2872_s11 = scalar_lea.hbm %s3512_s7, 256 }
0x10f6   : > { %p2869_p9 = scmp.ne.s32.totalorder %s3460_s29, %s2868_s10  ;;  %p2873_p0 = scmp.lt.u32.totalorder %s3460_s29, %s3512_s7 }
0x10f7   : > { %p2874_p11 = scmp.lt.u32.totalorder %s2872_s11, %s2868_s10  ;;  %p2876_p4 = scmp.lt.u32.totalorder %s2868_s10, %s3460_s29 }
0x10f8   : > { %p2870_p2 = pnand %p2869_p9, %p3079_p12 }
0x10f9   : > { %p2875_p1 = por %p2874_p11, %p2873_p0 }
0x10fa   : > { %p2871_p5 = pneg %p2870_p2 }
0x10fb   : > { %p2877_p6 = por %p2876_p4, %p2875_p1 }
0x10fd   : > { %p2878_p8 = pnand %p2877_p6, %p2871_p5 }
0x10ff   : > { %2881 = shalt.err (!%p2878_p8)
}
0x1100   : > { %2682 = dma.vmem_to_hbm [thread:$0]  (%p3079_p12), %s3462_s16, 128, %s3460_s29, %s2265_s28  }
0x1101 PF: > { %s2290_s14 = sand.u32 1, %s2912_s24   ;;  %p3541_p10 = scmp.ne.s32.totalorder %s3524_s8, 0 }
0x1102   : > { %p3542_p13 = scmp.ge.s32.totalorder %s2924_s27, 2  ;;  %s2291_s15 = scalar_lea.sflag [#allocation4], %s2290_s14 }
0x1104   : > { %p2693_p3 = pnand %p3542_p13, %p3541_p10 }
0x1106   : > { %2907 = dma.done.wait (!%p2693_p3), %s2291_s15, 128  }
0x1107   : > { %2909 = vsyncadd (!%p2693_p3), %s2291_s15, 4294967168  ;;  %p21_p7 = scmp.ge.s32.totalorder %s3044_s13, 4   ;;  %s3543_s24 = smov %s2916_s25 }
0x1108   : > { %s3544_s25 = smov %s2920_s26  ;;  %s3545_s26 = smov %s3075_s18 }
0x1109   : > { %s3546_s27 = smov %s3044_s13  ;;  %23 = sbr.rel (!%p21_p7) target bundleno = 6 (0x6), region = 98 }
0x1110   :  { %2296 = vsyncpa [#allocation3], 1 }
0x1111   :  { %2298 = vsyncpa [#allocation3 + $0x1], 1 }
0x1112   :  { %2299 = vsyncpa [#allocation6], 1 }
0x1113   :  { %2300 = vsyncpa [#allocation4], 1 }
0x1114   :  { %2302 = vsyncpa [#allocation4 + $0x1], 1 }

</bundles_post_ra>
